<compile_context>
chip_gen: v7x
topology: tpu7x:2x2x1
jax: 0.10.0
libtpu: 0.0.40
codegen_flags: <defaults>
</compile_context>

<pallas_src>
import functools
import math

import jax
import jax.numpy as jnp
from jax.experimental import pallas as pl
from jax.experimental.pallas import tpu as pltpu


# ----------------------------------------------------------------------------
# Fused kernel: self-attention over vision tokens followed by cross-attention
# (query = attended vision, key/value = semantic), batch = 1.
# All weights are pre-transposed / pre-folded so the kernel computes x @ W + b.
# ----------------------------------------------------------------------------
def _fused_cross_modal_kernel(num_heads,
                              vis_ref, sem_ref,
                              w_qkv_s_ref, b_qkv_s_ref,
                              w_oq_ref, b_oq_ref,
                              w_kv_c_ref, b_kv_c_ref,
                              w_o_c_ref, b_o_c_ref,
                              out_ref, attn_ref):
    E = vis_ref.shape[-1]
    H = num_heads
    d = E // H
    scale = 1.0 / math.sqrt(d)

    vis = vis_ref[...]          # (Lv, E)
    sem = sem_ref[...]          # (Ls, E)
    Lv = vis_ref.shape[0]
    Ls = sem_ref.shape[0]

    # ---------------- self-attention over vision tokens -------------------
    # Single fused QKV projection: (Lv, E) @ (E, 3E) -> (Lv, 3E).
    qkv = jnp.dot(vis, w_qkv_s_ref[...],
                  preferred_element_type=jnp.float32) + b_qkv_s_ref[...]
    q = qkv[:, :E]
    k = qkv[:, E:2 * E]
    v = qkv[:, 2 * E:]

    ctx_parts = []
    # Static unrolled loop over heads (H is small); PyTorch splits heads as
    # consecutive chunks of the embedding dimension.
    for h in range(H):
        qh = q[:, h * d:(h + 1) * d]
        kh = k[:, h * d:(h + 1) * d]
        vh = v[:, h * d:(h + 1) * d]
        # Contract on last dims (no explicit transpose of kh).
        s = jax.lax.dot_general(qh, kh, (((1,), (1,)), ((), ())),
                                preferred_element_type=jnp.float32) * scale
        s = s - jnp.max(s, axis=-1, keepdims=True)
        p = jnp.exp(s)
        # Internal softmax: approx reciprocal goes to the EUP slot (cheap).
        p = p * pl.reciprocal(jnp.sum(p, axis=-1, keepdims=True), approx=True)
        ctx_parts.append(jnp.dot(p, vh, preferred_element_type=jnp.float32))
    ctx = jnp.concatenate(ctx_parts, axis=-1)                   # (Lv, E)

    # ---------------- cross-attention: q = attended vision, kv = semantic --
    # w_oq / b_oq already fold (self out-proj) followed by (cross Q-proj), so
    # the attended-vision intermediate never materializes.
    q2 = jnp.dot(ctx, w_oq_ref[...],
                 preferred_element_type=jnp.float32) + b_oq_ref[...]
    # Fused K/V projection (key input == value input): (Ls, E) @ (E, 2E).
    kv2 = jnp.dot(sem, w_kv_c_ref[...],
                  preferred_element_type=jnp.float32) + b_kv_c_ref[...]
    k2 = kv2[:, :E]
    v2 = kv2[:, E:]

    attn_sum = jnp.zeros((Lv, Ls), jnp.float32)
    ctx2_parts = []
    for h in range(H):
        qh = q2[:, h * d:(h + 1) * d]
        kh = k2[:, h * d:(h + 1) * d]
        vh = v2[:, h * d:(h + 1) * d]
        s = jax.lax.dot_general(qh, kh, (((1,), (1,)), ((), ())),
                                preferred_element_type=jnp.float32) * scale
        s = s - jnp.max(s, axis=-1, keepdims=True)
        p = jnp.exp(s)
        # Attention weights are a user-visible output: keep exact division.
        p = p / jnp.sum(p, axis=-1, keepdims=True)
        attn_sum = attn_sum + p
        ctx2_parts.append(jnp.dot(p, vh, preferred_element_type=jnp.float32))
    ctx2 = jnp.concatenate(ctx2_parts, axis=-1)                 # (Lv, E)

    out_ref[...] = (jnp.dot(ctx2, w_o_c_ref[...],
                            preferred_element_type=jnp.float32)
                    + b_o_c_ref[...]).astype(out_ref.dtype)
    # PyTorch MHA default: need_weights=True, average_attn_weights=True.
    attn_ref[...] = (attn_sum * (1.0 / H)).astype(attn_ref.dtype)


# ----------------------------------------------------------------------------
# One-time weight preparation (hoisted out of the per-call path).
# PyTorch stores (out, in) weights; transpose once so the kernel does x @ W,
# and fold the self-attn out-proj into the cross-attn Q-proj.
# ----------------------------------------------------------------------------
def prepare_fused_params(params_self, params_cross):
    E = params_self["out_proj_weight"].shape[0]
    hp = jax.lax.Precision.HIGHEST
    in_w_s, in_b_s = params_self["in_proj_weight"], params_self["in_proj_bias"]
    in_w_c, in_b_c = params_cross["in_proj_weight"], params_cross["in_proj_bias"]

    w_o_s_t = params_self["out_proj_weight"].T                   # (E, E)
    b_o_s = params_self["out_proj_bias"]                         # (E,)
    w_q_c_t = in_w_c[:E].T                                       # (E, E)
    b_q_c = in_b_c[:E]                                           # (E,)
    # Fold:  q2 = (ctx @ Wo_s^T + bo_s) @ Wq_c^T + bq_c
    #           =  ctx @ (Wo_s^T @ Wq_c^T) + (bo_s @ Wq_c^T + bq_c)
    w_oq = jnp.dot(w_o_s_t, w_q_c_t, precision=hp)               # (E, E)
    b_oq = jnp.dot(b_o_s, w_q_c_t, precision=hp) + b_q_c         # (E,)

    return {
        # Self-attention: fused QKV projection.
        "w_qkv_self": in_w_s.T,                                  # (E, 3E)
        "b_qkv_self": in_b_s.reshape(1, 3 * E),
        # Folded (self out-proj  ∘  cross Q-proj).
        "w_oq": w_oq,                                            # (E, E)
        "b_oq": b_oq.reshape(1, E),
        # Cross-attention: K/V fused, output projection.
        "w_kv_cross": in_w_c[E:].T,                              # (E, 2E)
        "b_kv_cross": in_b_c[E:].reshape(1, 2 * E),
        "w_o_cross": params_cross["out_proj_weight"].T,          # (E, E)
        "b_o_cross": params_cross["out_proj_bias"].reshape(1, E),
    }


# ----------------------------------------------------------------------------
# Module wrapper: CrossModalTransformerLayer.forward
# ----------------------------------------------------------------------------
def cross_modal_transformer_layer(semantic_features, vision_features,
                                  fused_params, *, num_heads):
    """
    semantic_features: (L_sem, E)       -> unsqueeze(1) -> (L_sem, 1, E)
    vision_features:   (1, L_vis, E)    -> permute(1,0,2) -> (L_vis, 1, E)
    Returns:
      semantic_features_transformed: (L_vis, 1, E)
      attn_update:                   (1, L_vis, L_sem)   (head-averaged)
    """
    sem2 = semantic_features                                     # (L_sem, E)
    vis2 = jnp.transpose(vision_features, (1, 0, 2))[:, 0, :]    # (L_vis, E)
    Lv, E = vis2.shape
    Ls = sem2.shape[0]

    vmem = lambda: pl.BlockSpec(memory_space=pltpu.MemorySpace.VMEM)
    # TODO(synk): if E / L are scaled up, add a query-row grid
    # (dimension_semantics=("parallel",)) and BlockSpec tiling sized against
    # v7x's 64 MiB VMEM; at these tiny shapes a gridless resident kernel wins.
    out, attn = pl.pallas_call(
        functools.partial(_fused_cross_modal_kernel, num_heads),
        out_shape=(jax.ShapeDtypeStruct((Lv, E), jnp.float32),
                   jax.ShapeDtypeStruct((Lv, Ls), jnp.float32)),
        in_specs=[vmem() for _ in range(10)],
        out_specs=(vmem(), vmem()),
    )(vis2, sem2,
      fused_params["w_qkv_self"], fused_params["b_qkv_self"],
      fused_params["w_oq"], fused_params["b_oq"],
      fused_params["w_kv_cross"], fused_params["b_kv_cross"],
      fused_params["w_o_cross"], fused_params["b_o_cross"])

    return out[:, None, :], attn[None, :, :]


# ----------------------------------------------------------------------------
# Pure-JAX reference (for correctness check), PyTorch-MHA math.
# ----------------------------------------------------------------------------
def _mha_ref(q, k, v, params, num_heads):
    E = q.shape[-1]
    d = E // num_heads
    hp = jax.lax.Precision.HIGHEST
    in_w, in_b = params["in_proj_weight"], params["in_proj_bias"]
    qq = jnp.dot(q, in_w[:E].T, precision=hp) + in_b[:E]
    kk = jnp.dot(k, in_w[E:2 * E].T, precision=hp) + in_b[E:2 * E]
    vv = jnp.dot(v, in_w[2 * E:].T, precision=hp) + in_b[2 * E:]
    outs, attns = [], []
    for h in range(num_heads):
        qh, kh, vh = (qq[:, h * d:(h + 1) * d], kk[:, h * d:(h + 1) * d],
                      vv[:, h * d:(h + 1) * d])
        s = jnp.dot(qh, kh.T, precision=hp) / math.sqrt(d)
        p = jax.nn.softmax(s, axis=-1)
        attns.append(p)
        outs.append(jnp.dot(p, vh, precision=hp))
    ctx = jnp.concatenate(outs, axis=-1)
    out = jnp.dot(ctx, params["out_proj_weight"].T, precision=hp) + params["out_proj_bias"]
    return out, sum(attns) / num_heads


def _ref_forward(sem, vis, p_self, p_cross, num_heads):
    vis2 = jnp.transpose(vis, (1, 0, 2))[:, 0, :]
    a, _ = _mha_ref(vis2, vis2, vis2, p_self, num_heads)
    t, w = _mha_ref(a, sem, sem, p_cross, num_heads)
    return t[:, None, :], w[None, :, :]


def init_mha_params(key, E):
    k1, k2, k3 = jax.random.split(key, 3)
    return {
        "in_proj_weight": jax.random.normal(k1, (3 * E, E), jnp.float32) / math.sqrt(E),
        "in_proj_bias": 0.02 * jax.random.normal(k2, (3 * E,), jnp.float32),
        "out_proj_weight": jax.random.normal(k3, (E, E), jnp.float32) / math.sqrt(E),
        "out_proj_bias": jnp.zeros((E,), jnp.float32),
    }


if __name__ == "__main__":
    feature_dim = 32
    num_heads = 4
    L_sem = 8
    L_vis = 16

    key = jax.random.PRNGKey(0)
    k_sem, k_vis, k_p1, k_p2 = jax.random.split(key, 4)

    # Batch must be 1 for the module's cross-attention to be well-formed.
    semantic_features = jax.random.normal(k_sem, (L_sem, feature_dim), jnp.float32)
    vision_features = jax.random.normal(k_vis, (1, L_vis, feature_dim), jnp.float32)

    params_self = init_mha_params(k_p1, feature_dim)
    params_cross = init_mha_params(k_p2, feature_dim)

    # Weight transposes / projection folding done once, outside the per-call path.
    fused_params = prepare_fused_params(params_self, params_cross)

    forward = jax.jit(functools.partial(cross_modal_transformer_layer,
                                        num_heads=num_heads))
    transformed, attn_update = forward(semantic_features, vision_features,
                                       fused_params)
    transformed = jax.block_until_ready(transformed)
    attn_update = jax.block_until_ready(attn_update)

    assert transformed.shape == (L_vis, 1, feature_dim)
    assert attn_update.shape == (1, L_vis, L_sem)

    ref_t, ref_a = _ref_forward(semantic_features, vision_features,
                                params_self, params_cross, num_heads)
    assert jnp.allclose(transformed, ref_t, atol=2e-3, rtol=2e-3)
    assert jnp.allclose(attn_update, ref_a, atol=2e-3, rtol=2e-3)

    print("KERNEL_OK")
</pallas_src>

<mosaic_0001>
module attributes {stable_mosaic.version = 11 : i64} {
  func.func @_fused_cross_modal_kernel(%arg0: memref<16x32xf32, #tpu.memory_space<vmem>>, %arg1: memref<8x32xf32, #tpu.memory_space<vmem>>, %arg2: memref<32x96xf32, #tpu.memory_space<vmem>>, %arg3: memref<1x96xf32, #tpu.memory_space<vmem>>, %arg4: memref<32x32xf32, #tpu.memory_space<vmem>>, %arg5: memref<1x32xf32, #tpu.memory_space<vmem>>, %arg6: memref<32x64xf32, #tpu.memory_space<vmem>>, %arg7: memref<1x64xf32, #tpu.memory_space<vmem>>, %arg8: memref<32x32xf32, #tpu.memory_space<vmem>>, %arg9: memref<1x32xf32, #tpu.memory_space<vmem>>, %arg10: memref<16x32xf32, #tpu.memory_space<vmem>>, %arg11: memref<16x8xf32, #tpu.memory_space<vmem>>) attributes {dimension_semantics = [], scalar_prefetch = 0 : i64, scratch_operands = 0 : i64, tpu.core_type = #tpu.core_type<tc>} {
    %c0 = arith.constant 0 : index
    %c0_0 = arith.constant 0 : index
    %0 = vector.load %arg0[%c0, %c0_0] : memref<16x32xf32, #tpu.memory_space<vmem>>, vector<16x32xf32>
    %c0_1 = arith.constant 0 : index
    %c0_2 = arith.constant 0 : index
    %1 = vector.load %arg1[%c0_1, %c0_2] : memref<8x32xf32, #tpu.memory_space<vmem>>, vector<8x32xf32>
    %c0_3 = arith.constant 0 : index
    %c0_4 = arith.constant 0 : index
    %2 = vector.load %arg2[%c0_3, %c0_4] : memref<32x96xf32, #tpu.memory_space<vmem>>, vector<32x96xf32>
    %cst = arith.constant dense<0.000000e+00> : vector<16x96xf32>
    %3 = tpu.matmul %0, %2, %cst {dimension_numbers = #tpu.dot_dimension_numbers<[1], [0], [0], [1], [0, 0, 1, 1], [], []>} : vector<16x32xf32>, vector<32x96xf32>, vector<16x96xf32> -> vector<16x96xf32>
    %c0_5 = arith.constant 0 : index
    %c0_6 = arith.constant 0 : index
    %4 = vector.load %arg3[%c0_5, %c0_6] : memref<1x96xf32, #tpu.memory_space<vmem>>, vector<1x96xf32>
    %5 = vector.broadcast %4 : vector<1x96xf32> to vector<16x96xf32>
    %6 = arith.addf %3, %5 : vector<16x96xf32>
    %7 = vector.extract_strided_slice %6 {offsets = [0, 0], sizes = [16, 32], strides = [1, 1]} : vector<16x96xf32> to vector<16x32xf32>
    %8 = vector.extract_strided_slice %6 {offsets = [0, 32], sizes = [16, 32], strides = [1, 1]} : vector<16x96xf32> to vector<16x32xf32>
    %9 = vector.extract_strided_slice %6 {offsets = [0, 64], sizes = [16, 32], strides = [1, 1]} : vector<16x96xf32> to vector<16x32xf32>
    %10 = vector.extract_strided_slice %7 {offsets = [0, 0], sizes = [16, 8], strides = [1, 1]} : vector<16x32xf32> to vector<16x8xf32>
    %11 = vector.extract_strided_slice %8 {offsets = [0, 0], sizes = [16, 8], strides = [1, 1]} : vector<16x32xf32> to vector<16x8xf32>
    %12 = vector.extract_strided_slice %9 {offsets = [0, 0], sizes = [16, 8], strides = [1, 1]} : vector<16x32xf32> to vector<16x8xf32>
    %cst_7 = arith.constant dense<0.000000e+00> : vector<16x16xf32>
    %13 = tpu.matmul %10, %11, %cst_7 {dimension_numbers = #tpu.dot_dimension_numbers<[1], [1], [0], [0], [0, 0, 1, 0], [], []>} : vector<16x8xf32>, vector<16x8xf32>, vector<16x16xf32> -> vector<16x16xf32>
    %cst_8 = arith.constant 0.353553385 : f32
    %14 = vector.broadcast %cst_8 : f32 to vector<16x16xf32>
    %15 = arith.mulf %13, %14 : vector<16x16xf32>
    %cst_9 = arith.constant dense<0xFF800000> : vector<16xf32>
    %16 = vector.multi_reduction <maximumf>, %15, %cst_9 [1] : vector<16x16xf32> to vector<16xf32>
    %17 = vector.shape_cast %16 : vector<16xf32> to vector<16x1xf32>
    %18 = vector.broadcast %17 : vector<16x1xf32> to vector<16x16xf32>
    %19 = arith.subf %15, %18 : vector<16x16xf32>
    %20 = math.exp %19 : vector<16x16xf32>
    %cst_10 = arith.constant dense<0.000000e+00> : vector<16xf32>
    %21 = vector.multi_reduction <add>, %20, %cst_10 [1] : vector<16x16xf32> to vector<16xf32>
    %22 = vector.shape_cast %21 : vector<16xf32> to vector<16x1xf32>
    %23 = tpu.reciprocal %22 {approx = true} : vector<16x1xf32> -> vector<16x1xf32>
    %24 = vector.broadcast %23 : vector<16x1xf32> to vector<16x16xf32>
    %25 = arith.mulf %20, %24 : vector<16x16xf32>
    %cst_11 = arith.constant dense<0.000000e+00> : vector<16x8xf32>
    %26 = tpu.matmul %25, %12, %cst_11 {dimension_numbers = #tpu.dot_dimension_numbers<[1], [0], [0], [1], [0, 0, 1, 1], [], []>} : vector<16x16xf32>, vector<16x8xf32>, vector<16x8xf32> -> vector<16x8xf32>
    %27 = vector.extract_strided_slice %7 {offsets = [0, 8], sizes = [16, 8], strides = [1, 1]} : vector<16x32xf32> to vector<16x8xf32>
    %28 = vector.extract_strided_slice %8 {offsets = [0, 8], sizes = [16, 8], strides = [1, 1]} : vector<16x32xf32> to vector<16x8xf32>
    %29 = vector.extract_strided_slice %9 {offsets = [0, 8], sizes = [16, 8], strides = [1, 1]} : vector<16x32xf32> to vector<16x8xf32>
    %cst_12 = arith.constant dense<0.000000e+00> : vector<16x16xf32>
    %30 = tpu.matmul %27, %28, %cst_12 {dimension_numbers = #tpu.dot_dimension_numbers<[1], [1], [0], [0], [0, 0, 1, 0], [], []>} : vector<16x8xf32>, vector<16x8xf32>, vector<16x16xf32> -> vector<16x16xf32>
    %cst_13 = arith.constant 0.353553385 : f32
    %31 = vector.broadcast %cst_13 : f32 to vector<16x16xf32>
    %32 = arith.mulf %30, %31 : vector<16x16xf32>
    %cst_14 = arith.constant dense<0xFF800000> : vector<16xf32>
    %33 = vector.multi_reduction <maximumf>, %32, %cst_14 [1] : vector<16x16xf32> to vector<16xf32>
    %34 = vector.shape_cast %33 : vector<16xf32> to vector<16x1xf32>
    %35 = vector.broadcast %34 : vector<16x1xf32> to vector<16x16xf32>
    %36 = arith.subf %32, %35 : vector<16x16xf32>
    %37 = math.exp %36 : vector<16x16xf32>
    %cst_15 = arith.constant dense<0.000000e+00> : vector<16xf32>
    %38 = vector.multi_reduction <add>, %37, %cst_15 [1] : vector<16x16xf32> to vector<16xf32>
    %39 = vector.shape_cast %38 : vector<16xf32> to vector<16x1xf32>
    %40 = tpu.reciprocal %39 {approx = true} : vector<16x1xf32> -> vector<16x1xf32>
    %41 = vector.broadcast %40 : vector<16x1xf32> to vector<16x16xf32>
    %42 = arith.mulf %37, %41 : vector<16x16xf32>
    %cst_16 = arith.constant dense<0.000000e+00> : vector<16x8xf32>
    %43 = tpu.matmul %42, %29, %cst_16 {dimension_numbers = #tpu.dot_dimension_numbers<[1], [0], [0], [1], [0, 0, 1, 1], [], []>} : vector<16x16xf32>, vector<16x8xf32>, vector<16x8xf32> -> vector<16x8xf32>
    %44 = vector.extract_strided_slice %7 {offsets = [0, 16], sizes = [16, 8], strides = [1, 1]} : vector<16x32xf32> to vector<16x8xf32>
    %45 = vector.extract_strided_slice %8 {offsets = [0, 16], sizes = [16, 8], strides = [1, 1]} : vector<16x32xf32> to vector<16x8xf32>
    %46 = vector.extract_strided_slice %9 {offsets = [0, 16], sizes = [16, 8], strides = [1, 1]} : vector<16x32xf32> to vector<16x8xf32>
    %cst_17 = arith.constant dense<0.000000e+00> : vector<16x16xf32>
    %47 = tpu.matmul %44, %45, %cst_17 {dimension_numbers = #tpu.dot_dimension_numbers<[1], [1], [0], [0], [0, 0, 1, 0], [], []>} : vector<16x8xf32>, vector<16x8xf32>, vector<16x16xf32> -> vector<16x16xf32>
    %cst_18 = arith.constant 0.353553385 : f32
    %48 = vector.broadcast %cst_18 : f32 to vector<16x16xf32>
    %49 = arith.mulf %47, %48 : vector<16x16xf32>
    %cst_19 = arith.constant dense<0xFF800000> : vector<16xf32>
    %50 = vector.multi_reduction <maximumf>, %49, %cst_19 [1] : vector<16x16xf32> to vector<16xf32>
    %51 = vector.shape_cast %50 : vector<16xf32> to vector<16x1xf32>
    %52 = vector.broadcast %51 : vector<16x1xf32> to vector<16x16xf32>
    %53 = arith.subf %49, %52 : vector<16x16xf32>
    %54 = math.exp %53 : vector<16x16xf32>
    %cst_20 = arith.constant dense<0.000000e+00> : vector<16xf32>
    %55 = vector.multi_reduction <add>, %54, %cst_20 [1] : vector<16x16xf32> to vector<16xf32>
    %56 = vector.shape_cast %55 : vector<16xf32> to vector<16x1xf32>
    %57 = tpu.reciprocal %56 {approx = true} : vector<16x1xf32> -> vector<16x1xf32>
    %58 = vector.broadcast %57 : vector<16x1xf32> to vector<16x16xf32>
    %59 = arith.mulf %54, %58 : vector<16x16xf32>
    %cst_21 = arith.constant dense<0.000000e+00> : vector<16x8xf32>
    %60 = tpu.matmul %59, %46, %cst_21 {dimension_numbers = #tpu.dot_dimension_numbers<[1], [0], [0], [1], [0, 0, 1, 1], [], []>} : vector<16x16xf32>, vector<16x8xf32>, vector<16x8xf32> -> vector<16x8xf32>
    %61 = vector.extract_strided_slice %7 {offsets = [0, 24], sizes = [16, 8], strides = [1, 1]} : vector<16x32xf32> to vector<16x8xf32>
    %62 = vector.extract_strided_slice %8 {offsets = [0, 24], sizes = [16, 8], strides = [1, 1]} : vector<16x32xf32> to vector<16x8xf32>
    %63 = vector.extract_strided_slice %9 {offsets = [0, 24], sizes = [16, 8], strides = [1, 1]} : vector<16x32xf32> to vector<16x8xf32>
    %cst_22 = arith.constant dense<0.000000e+00> : vector<16x16xf32>
    %64 = tpu.matmul %61, %62, %cst_22 {dimension_numbers = #tpu.dot_dimension_numbers<[1], [1], [0], [0], [0, 0, 1, 0], [], []>} : vector<16x8xf32>, vector<16x8xf32>, vector<16x16xf32> -> vector<16x16xf32>
    %cst_23 = arith.constant 0.353553385 : f32
    %65 = vector.broadcast %cst_23 : f32 to vector<16x16xf32>
    %66 = arith.mulf %64, %65 : vector<16x16xf32>
    %cst_24 = arith.constant dense<0xFF800000> : vector<16xf32>
    %67 = vector.multi_reduction <maximumf>, %66, %cst_24 [1] : vector<16x16xf32> to vector<16xf32>
    %68 = vector.shape_cast %67 : vector<16xf32> to vector<16x1xf32>
    %69 = vector.broadcast %68 : vector<16x1xf32> to vector<16x16xf32>
    %70 = arith.subf %66, %69 : vector<16x16xf32>
    %71 = math.exp %70 : vector<16x16xf32>
    %cst_25 = arith.constant dense<0.000000e+00> : vector<16xf32>
    %72 = vector.multi_reduction <add>, %71, %cst_25 [1] : vector<16x16xf32> to vector<16xf32>
    %73 = vector.shape_cast %72 : vector<16xf32> to vector<16x1xf32>
    %74 = tpu.reciprocal %73 {approx = true} : vector<16x1xf32> -> vector<16x1xf32>
    %75 = vector.broadcast %74 : vector<16x1xf32> to vector<16x16xf32>
    %76 = arith.mulf %71, %75 : vector<16x16xf32>
    %cst_26 = arith.constant dense<0.000000e+00> : vector<16x8xf32>
    %77 = tpu.matmul %76, %63, %cst_26 {dimension_numbers = #tpu.dot_dimension_numbers<[1], [0], [0], [1], [0, 0, 1, 1], [], []>} : vector<16x16xf32>, vector<16x8xf32>, vector<16x8xf32> -> vector<16x8xf32>
    %78 = tpu.concatenate %26, %43, %60, %77 in 1 : vector<16x8xf32>, vector<16x8xf32>, vector<16x8xf32>, vector<16x8xf32> -> vector<16x32xf32>
    %c0_27 = arith.constant 0 : index
    %c0_28 = arith.constant 0 : index
    %79 = vector.load %arg4[%c0_27, %c0_28] : memref<32x32xf32, #tpu.memory_space<vmem>>, vector<32x32xf32>
    %cst_29 = arith.constant dense<0.000000e+00> : vector<16x32xf32>
    %80 = tpu.matmul %78, %79, %cst_29 {dimension_numbers = #tpu.dot_dimension_numbers<[1], [0], [0], [1], [0, 0, 1, 1], [], []>} : vector<16x32xf32>, vector<32x32xf32>, vector<16x32xf32> -> vector<16x32xf32>
    %c0_30 = arith.constant 0 : index
    %c0_31 = arith.constant 0 : index
    %81 = vector.load %arg5[%c0_30, %c0_31] : memref<1x32xf32, #tpu.memory_space<vmem>>, vector<1x32xf32>
    %82 = vector.broadcast %81 : vector<1x32xf32> to vector<16x32xf32>
    %83 = arith.addf %80, %82 : vector<16x32xf32>
    %c0_32 = arith.constant 0 : index
    %c0_33 = arith.constant 0 : index
    %84 = vector.load %arg6[%c0_32, %c0_33] : memref<32x64xf32, #tpu.memory_space<vmem>>, vector<32x64xf32>
    %cst_34 = arith.constant dense<0.000000e+00> : vector<8x64xf32>
    %85 = tpu.matmul %1, %84, %cst_34 {dimension_numbers = #tpu.dot_dimension_numbers<[1], [0], [0], [1], [0, 0, 1, 1], [], []>} : vector<8x32xf32>, vector<32x64xf32>, vector<8x64xf32> -> vector<8x64xf32>
    %c0_35 = arith.constant 0 : index
    %c0_36 = arith.constant 0 : index
    %86 = vector.load %arg7[%c0_35, %c0_36] : memref<1x64xf32, #tpu.memory_space<vmem>>, vector<1x64xf32>
    %87 = vector.broadcast %86 : vector<1x64xf32> to vector<8x64xf32>
    %88 = arith.addf %85, %87 : vector<8x64xf32>
    %89 = vector.extract_strided_slice %88 {offsets = [0, 0], sizes = [8, 32], strides = [1, 1]} : vector<8x64xf32> to vector<8x32xf32>
    %90 = vector.extract_strided_slice %88 {offsets = [0, 32], sizes = [8, 32], strides = [1, 1]} : vector<8x64xf32> to vector<8x32xf32>
    %cst_37 = arith.constant 0.000000e+00 : f32
    %91 = vector.broadcast %cst_37 : f32 to vector<16x8xf32>
    %92 = vector.extract_strided_slice %83 {offsets = [0, 0], sizes = [16, 8], strides = [1, 1]} : vector<16x32xf32> to vector<16x8xf32>
    %93 = vector.extract_strided_slice %89 {offsets = [0, 0], sizes = [8, 8], strides = [1, 1]} : vector<8x32xf32> to vector<8x8xf32>
    %94 = vector.extract_strided_slice %90 {offsets = [0, 0], sizes = [8, 8], strides = [1, 1]} : vector<8x32xf32> to vector<8x8xf32>
    %cst_38 = arith.constant dense<0.000000e+00> : vector<16x8xf32>
    %95 = tpu.matmul %92, %93, %cst_38 {dimension_numbers = #tpu.dot_dimension_numbers<[1], [1], [0], [0], [0, 0, 1, 0], [], []>} : vector<16x8xf32>, vector<8x8xf32>, vector<16x8xf32> -> vector<16x8xf32>
    %cst_39 = arith.constant 0.353553385 : f32
    %96 = vector.broadcast %cst_39 : f32 to vector<16x8xf32>
    %97 = arith.mulf %95, %96 : vector<16x8xf32>
    %cst_40 = arith.constant dense<0xFF800000> : vector<16xf32>
    %98 = vector.multi_reduction <maximumf>, %97, %cst_40 [1] : vector<16x8xf32> to vector<16xf32>
    %99 = vector.shape_cast %98 : vector<16xf32> to vector<16x1xf32>
    %100 = vector.broadcast %99 : vector<16x1xf32> to vector<16x8xf32>
    %101 = arith.subf %97, %100 : vector<16x8xf32>
    %102 = math.exp %101 : vector<16x8xf32>
    %cst_41 = arith.constant dense<0.000000e+00> : vector<16xf32>
    %103 = vector.multi_reduction <add>, %102, %cst_41 [1] : vector<16x8xf32> to vector<16xf32>
    %104 = vector.shape_cast %103 : vector<16xf32> to vector<16x1xf32>
    %105 = vector.broadcast %104 : vector<16x1xf32> to vector<16x8xf32>
    %106 = arith.divf %102, %105 : vector<16x8xf32>
    %107 = arith.addf %91, %106 : vector<16x8xf32>
    %cst_42 = arith.constant dense<0.000000e+00> : vector<16x8xf32>
    %108 = tpu.matmul %106, %94, %cst_42 {dimension_numbers = #tpu.dot_dimension_numbers<[1], [0], [0], [1], [0, 0, 1, 1], [], []>} : vector<16x8xf32>, vector<8x8xf32>, vector<16x8xf32> -> vector<16x8xf32>
    %109 = vector.extract_strided_slice %83 {offsets = [0, 8], sizes = [16, 8], strides = [1, 1]} : vector<16x32xf32> to vector<16x8xf32>
    %110 = vector.extract_strided_slice %89 {offsets = [0, 8], sizes = [8, 8], strides = [1, 1]} : vector<8x32xf32> to vector<8x8xf32>
    %111 = vector.extract_strided_slice %90 {offsets = [0, 8], sizes = [8, 8], strides = [1, 1]} : vector<8x32xf32> to vector<8x8xf32>
    %cst_43 = arith.constant dense<0.000000e+00> : vector<16x8xf32>
    %112 = tpu.matmul %109, %110, %cst_43 {dimension_numbers = #tpu.dot_dimension_numbers<[1], [1], [0], [0], [0, 0, 1, 0], [], []>} : vector<16x8xf32>, vector<8x8xf32>, vector<16x8xf32> -> vector<16x8xf32>
    %cst_44 = arith.constant 0.353553385 : f32
    %113 = vector.broadcast %cst_44 : f32 to vector<16x8xf32>
    %114 = arith.mulf %112, %113 : vector<16x8xf32>
    %cst_45 = arith.constant dense<0xFF800000> : vector<16xf32>
    %115 = vector.multi_reduction <maximumf>, %114, %cst_45 [1] : vector<16x8xf32> to vector<16xf32>
    %116 = vector.shape_cast %115 : vector<16xf32> to vector<16x1xf32>
    %117 = vector.broadcast %116 : vector<16x1xf32> to vector<16x8xf32>
    %118 = arith.subf %114, %117 : vector<16x8xf32>
    %119 = math.exp %118 : vector<16x8xf32>
    %cst_46 = arith.constant dense<0.000000e+00> : vector<16xf32>
    %120 = vector.multi_reduction <add>, %119, %cst_46 [1] : vector<16x8xf32> to vector<16xf32>
    %121 = vector.shape_cast %120 : vector<16xf32> to vector<16x1xf32>
    %122 = vector.broadcast %121 : vector<16x1xf32> to vector<16x8xf32>
    %123 = arith.divf %119, %122 : vector<16x8xf32>
    %124 = arith.addf %107, %123 : vector<16x8xf32>
    %cst_47 = arith.constant dense<0.000000e+00> : vector<16x8xf32>
    %125 = tpu.matmul %123, %111, %cst_47 {dimension_numbers = #tpu.dot_dimension_numbers<[1], [0], [0], [1], [0, 0, 1, 1], [], []>} : vector<16x8xf32>, vector<8x8xf32>, vector<16x8xf32> -> vector<16x8xf32>
    %126 = vector.extract_strided_slice %83 {offsets = [0, 16], sizes = [16, 8], strides = [1, 1]} : vector<16x32xf32> to vector<16x8xf32>
    %127 = vector.extract_strided_slice %89 {offsets = [0, 16], sizes = [8, 8], strides = [1, 1]} : vector<8x32xf32> to vector<8x8xf32>
    %128 = vector.extract_strided_slice %90 {offsets = [0, 16], sizes = [8, 8], strides = [1, 1]} : vector<8x32xf32> to vector<8x8xf32>
    %cst_48 = arith.constant dense<0.000000e+00> : vector<16x8xf32>
    %129 = tpu.matmul %126, %127, %cst_48 {dimension_numbers = #tpu.dot_dimension_numbers<[1], [1], [0], [0], [0, 0, 1, 0], [], []>} : vector<16x8xf32>, vector<8x8xf32>, vector<16x8xf32> -> vector<16x8xf32>
    %cst_49 = arith.constant 0.353553385 : f32
    %130 = vector.broadcast %cst_49 : f32 to vector<16x8xf32>
    %131 = arith.mulf %129, %130 : vector<16x8xf32>
    %cst_50 = arith.constant dense<0xFF800000> : vector<16xf32>
    %132 = vector.multi_reduction <maximumf>, %131, %cst_50 [1] : vector<16x8xf32> to vector<16xf32>
    %133 = vector.shape_cast %132 : vector<16xf32> to vector<16x1xf32>
    %134 = vector.broadcast %133 : vector<16x1xf32> to vector<16x8xf32>
    %135 = arith.subf %131, %134 : vector<16x8xf32>
    %136 = math.exp %135 : vector<16x8xf32>
    %cst_51 = arith.constant dense<0.000000e+00> : vector<16xf32>
    %137 = vector.multi_reduction <add>, %136, %cst_51 [1] : vector<16x8xf32> to vector<16xf32>
    %138 = vector.shape_cast %137 : vector<16xf32> to vector<16x1xf32>
    %139 = vector.broadcast %138 : vector<16x1xf32> to vector<16x8xf32>
    %140 = arith.divf %136, %139 : vector<16x8xf32>
    %141 = arith.addf %124, %140 : vector<16x8xf32>
    %cst_52 = arith.constant dense<0.000000e+00> : vector<16x8xf32>
    %142 = tpu.matmul %140, %128, %cst_52 {dimension_numbers = #tpu.dot_dimension_numbers<[1], [0], [0], [1], [0, 0, 1, 1], [], []>} : vector<16x8xf32>, vector<8x8xf32>, vector<16x8xf32> -> vector<16x8xf32>
    %143 = vector.extract_strided_slice %83 {offsets = [0, 24], sizes = [16, 8], strides = [1, 1]} : vector<16x32xf32> to vector<16x8xf32>
    %144 = vector.extract_strided_slice %89 {offsets = [0, 24], sizes = [8, 8], strides = [1, 1]} : vector<8x32xf32> to vector<8x8xf32>
    %145 = vector.extract_strided_slice %90 {offsets = [0, 24], sizes = [8, 8], strides = [1, 1]} : vector<8x32xf32> to vector<8x8xf32>
    %cst_53 = arith.constant dense<0.000000e+00> : vector<16x8xf32>
    %146 = tpu.matmul %143, %144, %cst_53 {dimension_numbers = #tpu.dot_dimension_numbers<[1], [1], [0], [0], [0, 0, 1, 0], [], []>} : vector<16x8xf32>, vector<8x8xf32>, vector<16x8xf32> -> vector<16x8xf32>
    %cst_54 = arith.constant 0.353553385 : f32
    %147 = vector.broadcast %cst_54 : f32 to vector<16x8xf32>
    %148 = arith.mulf %146, %147 : vector<16x8xf32>
    %cst_55 = arith.constant dense<0xFF800000> : vector<16xf32>
    %149 = vector.multi_reduction <maximumf>, %148, %cst_55 [1] : vector<16x8xf32> to vector<16xf32>
    %150 = vector.shape_cast %149 : vector<16xf32> to vector<16x1xf32>
    %151 = vector.broadcast %150 : vector<16x1xf32> to vector<16x8xf32>
    %152 = arith.subf %148, %151 : vector<16x8xf32>
    %153 = math.exp %152 : vector<16x8xf32>
    %cst_56 = arith.constant dense<0.000000e+00> : vector<16xf32>
    %154 = vector.multi_reduction <add>, %153, %cst_56 [1] : vector<16x8xf32> to vector<16xf32>
    %155 = vector.shape_cast %154 : vector<16xf32> to vector<16x1xf32>
    %156 = vector.broadcast %155 : vector<16x1xf32> to vector<16x8xf32>
    %157 = arith.divf %153, %156 : vector<16x8xf32>
    %158 = arith.addf %141, %157 : vector<16x8xf32>
    %cst_57 = arith.constant dense<0.000000e+00> : vector<16x8xf32>
    %159 = tpu.matmul %157, %145, %cst_57 {dimension_numbers = #tpu.dot_dimension_numbers<[1], [0], [0], [1], [0, 0, 1, 1], [], []>} : vector<16x8xf32>, vector<8x8xf32>, vector<16x8xf32> -> vector<16x8xf32>
    %160 = tpu.concatenate %108, %125, %142, %159 in 1 : vector<16x8xf32>, vector<16x8xf32>, vector<16x8xf32>, vector<16x8xf32> -> vector<16x32xf32>
    %c0_58 = arith.constant 0 : index
    %c0_59 = arith.constant 0 : index
    %161 = vector.load %arg8[%c0_58, %c0_59] : memref<32x32xf32, #tpu.memory_space<vmem>>, vector<32x32xf32>
    %cst_60 = arith.constant dense<0.000000e+00> : vector<16x32xf32>
    %162 = tpu.matmul %160, %161, %cst_60 {dimension_numbers = #tpu.dot_dimension_numbers<[1], [0], [0], [1], [0, 0, 1, 1], [], []>} : vector<16x32xf32>, vector<32x32xf32>, vector<16x32xf32> -> vector<16x32xf32>
    %c0_61 = arith.constant 0 : index
    %c0_62 = arith.constant 0 : index
    %163 = vector.load %arg9[%c0_61, %c0_62] : memref<1x32xf32, #tpu.memory_space<vmem>>, vector<1x32xf32>
    %164 = vector.broadcast %163 : vector<1x32xf32> to vector<16x32xf32>
    %165 = arith.addf %162, %164 : vector<16x32xf32>
    %c0_63 = arith.constant 0 : index
    %c0_64 = arith.constant 0 : index
    %166 = vector.load %arg10[%c0_63, %c0_64] : memref<16x32xf32, #tpu.memory_space<vmem>>, vector<16x32xf32>
    tpu.vector_store %arg10[%c0_63, %c0_64], %165 {strides = array<i32>} : memref<16x32xf32, #tpu.memory_space<vmem>>, vector<16x32xf32>,
    %cst_65 = arith.constant 2.500000e-01 : f32
    %167 = vector.broadcast %cst_65 : f32 to vector<16x8xf32>
    %168 = arith.mulf %158, %167 : vector<16x8xf32>
    %c0_66 = arith.constant 0 : index
    %c0_67 = arith.constant 0 : index
    %169 = vector.load %arg11[%c0_66, %c0_67] : memref<16x8xf32, #tpu.memory_space<vmem>>, vector<16x8xf32>
    tpu.vector_store %arg11[%c0_66, %c0_67], %168 {strides = array<i32>} : memref<16x8xf32, #tpu.memory_space<vmem>>, vector<16x8xf32>,
    return
  }
}

</mosaic_0001>

<bundles_post_ra>
// kernel: cross_modal_transformer_layer.1
= control target key start
LH: loop header
LB: loop body
LE: loop exit
PB: predicated region body
PF: predicated region fallthrough
CT: control target
= control target key end

     0   :  { %17 = vsyncpa [#allocation3], 0  ;;  %s3163_s0 = inlined_call_operand.hbm [shape: f32[16,32], index: 0, kind: input, shape index: {}]   ;;  %s3164_s1 = inlined_call_operand.hbm [shape: f32[8,32], index: 1, kind: input, shape index: {}]   ;;  %s3165_s2 = inlined_call_operand.vmem [shape: f32[32,96], index: 2, kind: input, shape index: {}]   ;;  %s3166_s3 = inlined_call_operand.vmem [shape: f32[1,96], index: 3, kind: input, shape index: {}]   ;;  %s3167_s4 = inlined_call_operand.hbm [shape: f32[32,32], index: 4, kind: input, shape index: {}]   ;;  %s3168_s5 = inlined_call_operand.vmem [shape: f32[1,32], index: 5, kind: input, shape index: {}]   ;;  %s3169_s6 = inlined_call_operand.hbm [shape: f32[32,64], index: 6, kind: input, shape index: {}]   ;;  %s3170_s7 = inlined_call_operand.vmem [shape: f32[1,64], index: 7, kind: input, shape index: {}]   ;;  %s3171_s8 = inlined_call_operand.hbm [shape: f32[32,32], index: 8, kind: input, shape index: {}]   ;;  %s3172_s9 = inlined_call_operand.vmem [shape: f32[1,32], index: 9, kind: input, shape index: {}]   ;;  %s3173_s10 = inlined_call_operand.hbm [shape: f32[16,32], index: 10, kind: output, shape index: {0}]   ;;  %s3174_s11 = inlined_call_operand.vmem [shape: f32[16,8], index: 11, kind: output, shape index: {1}]  }
   0x1   :  { %18 = vsyncpa [#allocation6], 0 }
   0x2   :  { %19 = vsyncpa [#allocation9], 0 }
   0x3   :  { %20 = vsyncpa [#allocation4], 0  ;;  %s2763_s17 = smov [#allocation5]   ;;  %s2623_s21 = scalar_lea.hbm %s3164_s1, 128 }
   0x4   :  { %s39_s18 = sshll.u32 %s2763_s17, 4  ;;  %p2624_p0 = scmp.ne.s32.totalorder %s3164_s1, %s2623_s21  ;;  %s40_s18 = int_to_ptr.vmem [resolvable:$true] %s39_s18 }
   0x5   :  { %p2627_p1 = scmp.lt.u32.totalorder %s2623_s21, %s3164_s1 }
   0x7   :  { %p2629_p2 = pnand %p2627_p1, %p2624_p0 }
   0x9   :  { %2632 = shalt.err (!%p2629_p2)
}
   0xa   :  { %s2633_s26 = scalar_lea.vmem %s40_s18, 128  ;;  %p2638_p4 = scmp.lt.s32.totalorder %s40_s18, %s40_s18 }
   0xb   :  { %p2634_p3 = scmp.ne.s32.totalorder %s40_s18, %s2633_s26  ;;  %p2639_p5 = scmp.lt.s32.totalorder %s2633_s26, %s2633_s26 }
   0xd   :  { %p2640_p6 = por %p2639_p5, %p2638_p4 }
   0xf   :  { %p2641_p7 = pnand %p2640_p6, %p2634_p3 }
  0x11   :  { %2644 = shalt.err (!%p2641_p7)
}
  0x12   :  { %42 = dma.hbm_to_vmem [thread:$0]  %s3164_s1, 128, %s40_s18, [#allocation6]  }
  0x13   :  { %s2764_s29 = smov [#allocation8]   ;;  %s2765_s12 = smov [#allocation2]  }
  0x14   :  { %s66_s30 = sshll.u32 %s2764_s29, 4  ;;  %s26_s13 = sshll.u32 %s2765_s12, 4  ;;  %s67_s30 = int_to_ptr.vmem [resolvable:$true] %s66_s30  ;;  %s27_s13 = int_to_ptr.vmem [resolvable:$true] %s26_s13 }
  0x15   :  { %s2645_s16 = scalar_lea.hbm %s3169_s6, 512 }
  0x16   :  { %p2646_p8 = scmp.ne.s32.totalorder %s3169_s6, %s2645_s16  ;;  %p2649_p9 = scmp.lt.u32.totalorder %s2645_s16, %s3169_s6 }
  0x18   :  { %p2651_p10 = pnand %p2649_p9, %p2646_p8 }
  0x1a   :  { %2654 = shalt.err (!%p2651_p10)
}
  0x1b   :  { %s2655_s1 = scalar_lea.vmem %s67_s30, 512  ;;  %p2660_p12 = scmp.lt.s32.totalorder %s67_s30, %s67_s30 }
  0x1c   :  { %p2656_p11 = scmp.ne.s32.totalorder %s67_s30, %s2655_s1  ;;  %p2661_p13 = scmp.lt.s32.totalorder %s2655_s1, %s2655_s1 }
  0x1e   :  { %p2662_p0 = por %p2661_p13, %p2660_p12 }
  0x20   :  { %p2663_p1 = pnand %p2662_p0, %p2656_p11 }
  0x22   :  { %2666 = shalt.err (!%p2663_p1)
}
  0x23   :  { %s2766_s18 = smov 128   ;;  %s2767_s22 = smov 8  }
  0x24   :  { %72 = dma.hbm_to_vmem [thread:$0]  %s3169_s6, 512, %s67_s30, [#allocation9], %s2766_s18, %s2766_s18, %s2767_s22  }
  0x25   :  { %s2667_s27 = scalar_lea.hbm %s3163_s0, 256 }
  0x26   :  { %p2668_p2 = scmp.ne.s32.totalorder %s3163_s0, %s2667_s27  ;;  %p2671_p3 = scmp.lt.u32.totalorder %s2667_s27, %s3163_s0 }
  0x28   :  { %p2673_p4 = pnand %p2671_p3, %p2668_p2 }
  0x2a   :  { %2676 = shalt.err (!%p2673_p4)
}
  0x2b   :  { %s2677_s15 = scalar_lea.vmem %s27_s13, 256  ;;  %p2682_p6 = scmp.lt.s32.totalorder %s27_s13, %s27_s13 }
  0x2c   :  { %p2678_p5 = scmp.ne.s32.totalorder %s27_s13, %s2677_s15  ;;  %p2683_p7 = scmp.lt.s32.totalorder %s2677_s15, %s2677_s15 }
  0x2e   :  { %p2684_p8 = por %p2683_p7, %p2682_p6 }
  0x30   :  { %p2685_p9 = pnand %p2684_p8, %p2678_p5 }
  0x32   :  { %2688 = shalt.err (!%p2685_p9)
}
  0x33   :  { %32 = dma.hbm_to_vmem [thread:$0]  %s3163_s0, 256, %s27_s13, [#allocation3], %s2766_s18, %s2766_s18, %s2767_s22  }
  0x34   :  { %s2768_s16 = smov [#allocation7]   ;;  %s2769_s19 = smov [#allocation10]  }
  0x35   :  { %s52_s17 = sshll.u32 %s2768_s16, 4  ;;  %s80_s20 = sshll.u32 %s2769_s19, 4  ;;  %s53_s17 = int_to_ptr.vmem [resolvable:$true] %s52_s17  ;;  %s81_s20 = int_to_ptr.vmem [resolvable:$true] %s80_s20 }
  0x36   :  { %s2689_s23 = scalar_lea.hbm %s3167_s4, 512 }
  0x37   :  { %p2690_p10 = scmp.ne.s32.totalorder %s3167_s4, %s2689_s23  ;;  %p2693_p11 = scmp.lt.u32.totalorder %s2689_s23, %s3167_s4 }
  0x39   :  { %p2695_p12 = pnand %p2693_p11, %p2690_p10 }
  0x3b   :  { %2698 = shalt.err (!%p2695_p12)
}
  0x3c   :  { %s2699_s0 = scalar_lea.vmem %s53_s17, 512  ;;  %p2704_p0 = scmp.lt.s32.totalorder %s53_s17, %s53_s17 }
  0x3d   :  { %p2700_p13 = scmp.ne.s32.totalorder %s53_s17, %s2699_s0  ;;  %p2705_p1 = scmp.lt.s32.totalorder %s2699_s0, %s2699_s0 }
  0x3f   :  { %p2706_p2 = por %p2705_p1, %p2704_p0 }
  0x41   :  { %p2707_p3 = pnand %p2706_p2, %p2700_p13 }
  0x43   :  { %2710 = shalt.err (!%p2707_p3)
}
  0x44   :  { %58 = dma.hbm_to_vmem [thread:$0]  %s3167_s4, 512, %s53_s17, [#allocation6], %s2766_s18, %s2766_s18, %s2767_s22  }
  0x45   :  { %s2711_s14 = scalar_lea.hbm %s3171_s8, 512 }
  0x46   :  { %p2712_p4 = scmp.ne.s32.totalorder %s3171_s8, %s2711_s14  ;;  %p2715_p5 = scmp.lt.u32.totalorder %s2711_s14, %s3171_s8 }
  0x48   :  { %p2717_p6 = pnand %p2715_p5, %p2712_p4 }
  0x4a   :  { %2720 = shalt.err (!%p2717_p6)
}
  0x4b   :  { %s2721_s19 = scalar_lea.vmem %s81_s20, 512  ;;  %p2726_p8 = scmp.lt.s32.totalorder %s81_s20, %s81_s20 }
  0x4c   :  { %p2722_p7 = scmp.ne.s32.totalorder %s81_s20, %s2721_s19  ;;  %p2727_p9 = scmp.lt.s32.totalorder %s2721_s19, %s2721_s19 }
  0x4e   :  { %p2728_p10 = por %p2727_p9, %p2726_p8 }
  0x50   :  { %p2729_p11 = pnand %p2728_p10, %p2722_p7 }
  0x52   :  { %2732 = shalt.err (!%p2729_p11)
}
  0x53   :  { %86 = dma.hbm_to_vmem [thread:$0]  %s3171_s8, 512, %s81_s20, [#allocation9], %s2766_s18, %s2766_s18, %s2767_s22  }
  0x54   :  { %2755 = dma.done.wait [#allocation3], 256  }
  0x55   :  { %2756 = vsyncadd [#allocation3], 4294967040 }
  0x56   :  { %2757 = dma.done.wait [#allocation6], 640  }
  0x57   :  { %2758 = vsyncadd [#allocation6], 4294966656 }
  0x58   :  { %2759 = dma.done.wait [#allocation9], 1024  }
  0x59   :  { %2760 = vsyncadd [#allocation9], 4294966272  ;;  %vm118_vm0 = vcmask 261120   ;;  %v107_v0 = vld [vmem:[%s3165_s2] sm:$0xff]  ;;  %v108_v1 = vld [vmem:[%s3165_s2 + $0x8] sm:$0xff]  ;;  %vm206_vm1 = vcmask 64512  }
  0x5a   :  { %v109_v2 = vld [vmem:[%s3165_s2 + $0x10] sm:$0xff]  ;;  %v2425_v3 = vpack.c.bf16 %v108_v1, %v107_v0  ;;  %v110_v4 = vld [vmem:[%s3165_s2 + $0x18] sm:$0xff]  ;;  %v104_v5 = vld [vmem:[#allocation2] sm:$0xff]  ;;  %s2770_s2 = smov 96   ;;  %vm292_vm3 = vcmask 130048   ;;  %s2772_s13 = smov 88  }
  0x5b   :  { %v2429_v6 = vpack.c.bf16 %v110_v4, %v109_v2  ;;  %2293 = vmatprep.mubr.msk.f32.mxu0 %vm118_vm0, %v104_v5  ;;  %v105_v7 = vld [vmem:[#allocation2 + $0x8] sm:$0xff]  ;;  %v2151_v8 = vld [vmem:[%s3166_s3] ss:$0 sm:$0xff]  ;;  %vm2950_vm2 = vmpackc.low %vm206_vm1, %vm206_vm1  ;;  %s2771_s3 = smov 64   ;;  %s2773_s28 = smov 120   ;;  %vm2783_vm4 = vmmov 0  }
  0x5c   :  { %2426 = vmatprep.subr.bf16.mxu0 %v2425_v3  ;;  %s2774_s29 = smov 56   ;;  %s2775_s12 = smov 80   ;;  %vm1036_vm5 = vcmask 195584  }
  0x5d   :  { %2428 = vmatpush3.bf16.msra.mxu0 %v2425_v3  ;;  %s2776_s14 = smov 112   ;;  %s2777_s15 = smov 72  }
  0x5e   :  { %2430 = vmatprep.subr.bf16.mxu0 %v2429_v6  ;;  %s2778_s6 = smov 104   ;;  %s2779_s30 = smov 48  }
  0x5f   :  { %s2780_s16 = smov 40   ;;  %s2781_s19 = smov 16  }
  0x60   :  { %s2785_s4 = smov 24   ;;  %s2786_s8 = smov [#allocation11]  }
  0x61   :  { %2432 = vmatpush3.bf16.msra.mxu0 %v2429_v6  ;;  %s2133_s20 = sshll.u32 %s2786_s8, 4  ;;  %s2134_s20 = int_to_ptr.vmem [resolvable:$true] %s2133_s20 }
  0x62   :  { %s2733_s27 = scalar_lea.vmem %s2134_s20, 256  ;;  %p2738_p13 = scmp.lt.s32.totalorder %s2134_s20, %s2134_s20 }
  0x63   :  { %p2734_p12 = scmp.ne.s32.totalorder %s2134_s20, %s2733_s27  ;;  %p2739_p0 = scmp.lt.s32.totalorder %s2733_s27, %s2733_s27 }
  0x64   :  { %2294 = vmatmul.mubr.msk.f32.vlgmr.msra.gmra.mrb[0].mxu0 %vm118_vm0, %v105_v7 }
  0x65   :  { %p2740_p1 = por %p2739_p0, %p2738_p13 }
  0x67   :  { %p2741_p2 = pnand %p2740_p1, %p2734_p12 }
 0x137   :  { %v2295_v9 = vpop.f32.mrb[0].mxu0 }
 0x138   :  { %v2936_v10 = vadd.f32 %v2295_v9, %v2151_v8  ;;  %v191_v11 = vpop.f32.mrb[1].mxu0 }
 0x139   :  { %v2938_v12 = vadd.f32 %v2151_v8, %v191_v11 }
 0x13b   :  { %2300 = vmatprep.mubr.msk.f32.mxu1 %vm206_vm1, %v2938_v12  ;;  %v2944_v13 = vpack.i.bf16 %v2936_v10, %v2938_v12 }
 0x13d   :  { %2520 = vrot.lane.b32.xlu0 %v2944_v13, %s2770_s2 }
 0x1af   :  { %v2521_v14 = vpop.permute.xlu0 %2520 }
 0x1b0   :  { %v2523_v15 = vunpack.i.h.bf16 %v2521_v14  ;;  %v2522_v16 = vunpack.i.l.bf16 %v2521_v14 }
 0x1b2   :  { %v2433_v18 = vpack.c.bf16 %v2523_v15, %v2522_v16 }
 0x1b4   :  { %2435 = vmatprep.subr.msk.bf16.mxu1 %vm2950_vm2, %v2433_v18 }
 0x1b5   :  { %2438 = vmatpush3.bf16.xpose.msk.msra.mxu1 %vm2950_vm2, %v2433_v18 }
 0x1bc   :  { %2301 = vmatmul.mubr.msk.f32.vlgmr.msra.gmra.mrb[0].mxu1 %vm206_vm1, %v2936_v10 }
 0x28f   :  { %v2302_v19 = vpop.f32.mrb[0].mxu1 }
 0x290   :  { %v291_v20 = vmul.f32 0.35355338, %v2302_v19  ;;  %v281_v21 = vpop.f32.mrb[1].mxu1 }
 0x291   :  { %v290_v22 = vmul.f32 0.35355338, %v281_v21 }
 0x292   :  { %v296_v23 = vsel %vm292_vm3, %v291_v20, -inf }
 0x293   :  { %297 = vmax.xlane.f32.xlu1 %v296_v23  ;;  %v293_v24 = vsel %vm292_vm3, %v290_v22, -inf }
 0x294   :  { %294 = vmax.xlane.f32.xlu0 %v293_v24 }
 0x2a4   :  { %2525 = vrot.lane.b32.xlu1 %v2944_v13, %s2771_s3 }
 0x2a8   :  { %2530 = vrot.lane.b32.xlu1 %v2944_v13, %s2772_s13 }
 0x2aa   :  { %404 = vrot.lane.b32.xlu0 %v2936_v10, %s2773_s28 }
 0x320   :  { %v298_v25 = vpop.xlane.xlu1 %297 }
 0x321   :  { %v300_v26 = vsub.f32 %v291_v20, %v298_v25  ;;  %v295_v27 = vpop.xlane.xlu0 %294 }
 0x322   :  { %v299_v28 = vsub.f32 %v290_v22, %v295_v27 }
 0x323   :  { %v303_v29 = vmul.f32 1.442695, %v300_v26 }
 0x324   :  { %v301_v30 = vmul.f32 1.442695, %v299_v28  ;;  %v2526_v31 = vpop.permute.xlu1 %2525 }
 0x325   :  { %2559 = vpow2.f32 %v303_v29  ;;  %v2528_v32 = vunpack.i.h.bf16 %v2526_v31  ;;  %v2527_v33 = vunpack.i.l.bf16 %v2526_v31  ;;  %v405_v50 = vpop.permute.xlu0 %404 }
 0x326   :  { %2561 = vpow2.f32 %v301_v30 }
 0x327   :  { %v2439_v34 = vpack.c.bf16 %v2528_v32, %v2527_v33 }
 0x328   :  { %v2531_v35 = vpop.permute.xlu1 %2530 }
 0x329   :  { %v2533_v36 = vunpack.i.h.bf16 %v2531_v35  ;;  %v2532_v37 = vunpack.i.l.bf16 %v2531_v35  ;;  %2440 = vmatprep.subr.bf16.mxu1 %v2439_v34 }
 0x32a   :  { %2442 = vmatpush3.bf16.msra.mxu1 %v2439_v34 }
 0x32b   :  { %v2443_v38 = vpack.c.bf16 %v2533_v36, %v2532_v37 }
 0x32d   :  { %2445 = vmatprep.subr.msk.bf16.mxu1 %vm2950_vm2, %v2443_v38 }
 0x32f   :  { %v2560_v39 = vpop.eup %2559 }
 0x330   :  { %v308_v40 = vsel %vm292_vm3, %v2560_v39, 0.0  ;;  %v2562_v41 = vpop.eup %2561 }
 0x331   :  { %309 = vadd.xlane.f32.xlu1 %v308_v40  ;;  %v305_v42 = vsel %vm292_vm3, %v2562_v41, 0.0 }
 0x335   :  { %306 = vadd.xlane.f32.xlu1 %v305_v42 }
 0x346   :  { %402 = vrot.lane.b32.xlu1 %v2938_v12, %s2773_s28 }
 0x3be   :  { %v310_v43 = vpop.xlane.xlu1 %309 }
 0x3bf   :  { %2563 = vrcp.f32 %v310_v43 }
 0x3c2   :  { %v307_v44 = vpop.xlane.xlu1 %306 }
 0x3c3   :  { %2565 = vrcp.f32 %v307_v44 }
 0x3c6   :  { %v403_v49 = vpop.permute.xlu1 %402 }
 0x3c9   :  { %v2564_v45 = vpop.eup %2563 }
 0x3ca   :  { %v314_v48 = vmul.f32 %v2564_v45, %v2560_v39 }
 0x3cd   :  { %v2566_v46 = vpop.eup %2565 }
 0x3ce   :  { %v313_v47 = vmul.f32 %v2566_v46, %v2562_v41 }
 0x3d0   :  { %2307 = vmatprep.mubr.msk.f32.mxu1 %vm292_vm3, %v313_v47 }
 0x3d1   :  { %2308 = vmatmul.mubr.msk.f32.vlgmr.msra.gmra.mrb[2].mxu1 %vm292_vm3, %v314_v48 }
 0x3d2   :  { %2448 = vmatpush3.bf16.xpose.msk.msra.mxu1 %vm2950_vm2, %v2443_v38  ;;  %2314 = vmatprep.mubr.msk.f32.mxu1 %vm206_vm1, %v403_v49 }
 0x3d9   :  { %2315 = vmatmul.mubr.msk.f32.vlgmr.msra.gmra.mrb[4].mxu1 %vm206_vm1, %v405_v50 }
 0x4a4   :  { %v2979_v51 = vpop.f32.mrb[2].mxu1 }
 0x4a5   :  { %v2981_v52 = vpop.f32.mrb[3].mxu1 }
 0x4ac   :  { %v2316_v53 = vpop.f32.mrb[4].mxu1 }
 0x4ad   :  { %v494_v54 = vmul.f32 0.35355338, %v2316_v53  ;;  %v484_v55 = vpop.f32.mrb[5].mxu1 }
 0x4ae   :  { %v493_v56 = vmul.f32 0.35355338, %v484_v55 }
 0x4af   :  { %v498_v57 = vsel %vm292_vm3, %v494_v54, -inf }
 0x4b0   :  { %499 = vmax.xlane.f32.xlu0 %v498_v57  ;;  %v495_v58 = vsel %vm292_vm3, %v493_v56, -inf }
 0x4b1   :  { %496 = vmax.xlane.f32.xlu1 %v495_v58 }
 0x4c2   :  { %2535 = vrot.lane.b32.xlu1 %v2944_v13, %s2774_s29 }
 0x4c6   :  { %2540 = vrot.lane.b32.xlu0 %v2944_v13, %s2775_s12  ;;  %604 = vrot.lane.b32.xlu1 %v2938_v12, %s2776_s14 }
 0x53d   :  { %v500_v59 = vpop.xlane.xlu0 %499 }
 0x53e   :  { %v502_v60 = vsub.f32 %v494_v54, %v500_v59  ;;  %v497_v61 = vpop.xlane.xlu1 %496 }
 0x53f   :  { %v501_v62 = vsub.f32 %v493_v56, %v497_v61 }
 0x540   :  { %v505_v63 = vmul.f32 1.442695, %v502_v60 }
 0x541   :  { %v503_v0 = vmul.f32 1.442695, %v501_v62  ;;  %v2541_v1 = vpop.permute.xlu0 %2540 }
 0x542   :  { %2567 = vpow2.f32 %v505_v63  ;;  %v2536_v2 = vpop.permute.xlu1 %2535  ;;  %v2543_v3 = vunpack.i.h.bf16 %v2541_v1  ;;  %v2542_v4 = vunpack.i.l.bf16 %v2541_v1 }
 0x543   :  { %v2538_v5 = vunpack.i.h.bf16 %v2536_v2  ;;  %v2537_v6 = vunpack.i.l.bf16 %v2536_v2  ;;  %2569 = vpow2.f32 %v503_v0 }
 0x544   :  { %v2453_v8 = vpack.c.bf16 %v2543_v3, %v2542_v4 }
 0x545   :  { %v2449_v7 = vpack.c.bf16 %v2538_v5, %v2537_v6 }
 0x546   :  { %v605_v16 = vpop.permute.xlu1 %604 }
 0x547   :  { %2450 = vmatprep.subr.bf16.mxu0 %v2449_v7 }
 0x548   :  { %2452 = vmatpush3.bf16.msra.mxu0 %v2449_v7 }
 0x549   :  { %2455 = vmatprep.subr.msk.bf16.mxu0 %vm2950_vm2, %v2453_v8 }
 0x54c   :  { %v2568_v9 = vpop.eup %2567 }
 0x54d   :  { %v510_v11 = vsel %vm292_vm3, %v2568_v9, 0.0  ;;  %v2570_v14 = vpop.eup %2569 }
 0x54e   :  { %511 = vadd.xlane.f32.xlu1 %v510_v11  ;;  %v507_v15 = vsel %vm292_vm3, %v2570_v14, 0.0 }
 0x552   :  { %508 = vadd.xlane.f32.xlu1 %v507_v15 }
 0x563   :  { %606 = vrot.lane.b32.xlu1 %v2936_v10, %s2776_s14 }
 0x5db   :  { %v512_v18 = vpop.xlane.xlu1 %511 }
 0x5dc   :  { %2571 = vrcp.f32 %v512_v18 }
 0x5df   :  { %v509_v19 = vpop.xlane.xlu1 %508 }
 0x5e0   :  { %2573 = vrcp.f32 %v509_v19 }
 0x5e3   :  { %v607_v24 = vpop.permute.xlu1 %606 }
 0x5e6   :  { %v2572_v20 = vpop.eup %2571 }
 0x5e7   :  { %v516_v23 = vmul.f32 %v2572_v20, %v2568_v9 }
 0x5ea   :  { %v2574_v21 = vpop.eup %2573 }
 0x5eb   :  { %v515_v22 = vmul.f32 %v2574_v21, %v2570_v14 }
 0x5ed   :  { %2321 = vmatprep.mubr.msk.f32.mxu0 %vm292_vm3, %v515_v22 }
 0x5ee   :  { %2322 = vmatmul.mubr.msk.f32.vlgmr.msra.gmra.mrb[2].mxu0 %vm292_vm3, %v516_v23 }
 0x5ef   :  { %2458 = vmatpush3.bf16.xpose.msk.msra.mxu0 %vm2950_vm2, %v2453_v8  ;;  %2328 = vmatprep.mubr.msk.f32.mxu0 %vm206_vm1, %v605_v16 }
 0x5f6   :  { %2329 = vmatmul.mubr.msk.f32.vlgmr.msra.gmra.mrb[4].mxu0 %vm206_vm1, %v607_v24 }
 0x6c1   :  { %v3002_v25 = vpop.f32.mrb[2].mxu0 }
 0x6c2   :  { %v3004_v26 = vpop.f32.mrb[3].mxu0 }
 0x6c9   :  { %v2330_v27 = vpop.f32.mrb[4].mxu0 }
 0x6ca   :  { %v696_v28 = vmul.f32 0.35355338, %v2330_v27  ;;  %v686_v29 = vpop.f32.mrb[5].mxu0  ;;  %v1133_v27 = vld [vmem:[#allocation8 + $0x10] sm:$0xff] }
 0x6cb   :  { %v695_v30 = vmul.f32 0.35355338, %v686_v29 }
 0x6cc   :  { %v700_v31 = vsel %vm292_vm3, %v696_v28, -inf }
 0x6cd   :  { %701 = vmax.xlane.f32.xlu0 %v700_v31  ;;  %v697_v32 = vsel %vm292_vm3, %v695_v30, -inf  ;;  %v1039_v31 = vld [vmem:[#allocation7] sm:$0xff] }
 0x6ce   :  { %698 = vmax.xlane.f32.xlu1 %v697_v32  ;;  %v1040_v32 = vld [vmem:[#allocation7 + $0x8] sm:$0xff] }
 0x75a   :  { %v702_v33 = vpop.xlane.xlu0 %701 }
 0x75b   :  { %v704_v34 = vsub.f32 %v696_v28, %v702_v33  ;;  %v699_v35 = vpop.xlane.xlu1 %698  ;;  %v2782_v28 = vmov 0.0|0.0   ;;  %v2784_v33 = vmov 0.0  }
 0x75c   :  { %v703_v36 = vsub.f32 %v695_v30, %v699_v35  ;;  %v1134_v30 = vld [vmem:[#allocation8 + $0x18] sm:$0xff]  ;;  %v1041_v35 = vld [vmem:[#allocation7 + $0x10] sm:$0xff] }
 0x75d   :  { %v707_v37 = vmul.f32 1.442695, %v704_v34  ;;  %v2473_v34 = vpack.c.bf16 %v1040_v32, %v1039_v31 }
 0x75e   :  { %v705_v38 = vmul.f32 1.442695, %v703_v36  ;;  %v1042_v36 = vld [vmem:[#allocation7 + $0x18] sm:$0xff] }
 0x75f   :  { %2575 = vpow2.f32 %v707_v37  ;;  %v2485_v37 = vpack.c.bf16 %v1134_v30, %v1133_v27 }
 0x760   :  { %2577 = vpow2.f32 %v705_v38  ;;  %v2477_v38 = vpack.c.bf16 %v1042_v36, %v1041_v35 }
 0x769   :  { %v2576_v39 = vpop.eup %2575 }
 0x76a   :  { %v2578_v40 = vpop.eup %2577  ;;  %v712_v41 = vsel %vm292_vm3, %v2576_v39, 0.0 }
 0x76b   :  { %713 = vadd.xlane.f32.xlu1 %v712_v41  ;;  %v709_v42 = vsel %vm292_vm3, %v2578_v40, 0.0 }
 0x76c   :  { %710 = vadd.xlane.f32.xlu0 %v709_v42  ;;  %v2181_v42 = vld [vmem:[%s3170_s7] ss:$0 sm:$0xff] }
 0x77c   :  { %2550 = vrot.lane.b32.xlu1 %v2944_v13, %s2777_s15 }
 0x780   :  { %806 = vrot.lane.b32.xlu1 %v2938_v12, %s2778_s6 }
 0x782   :  { %2545 = vrot.lane.b32.xlu0 %v2944_v13, %s2779_s30 }
 0x786   :  { %808 = vrot.lane.b32.xlu0 %v2936_v10, %s2778_s6 }
 0x7f8   :  { %v714_v43 = vpop.xlane.xlu1 %713 }
 0x7f9   :  { %2579 = vrcp.f32 %v714_v43  ;;  %v711_v44 = vpop.xlane.xlu0 %710 }
 0x7fa   :  { %2581 = vrcp.f32 %v711_v44 }
 0x7fc   :  { %v2551_v45 = vpop.permute.xlu1 %2550 }
 0x7fd   :  { %v2546_v46 = vpop.permute.xlu0 %2545  ;;  %v2553_v47 = vunpack.i.h.bf16 %v2551_v45  ;;  %v2552_v48 = vunpack.i.l.bf16 %v2551_v45 }
 0x7fe   :  { %v2548_v49 = vunpack.i.h.bf16 %v2546_v46  ;;  %v2547_v50 = vunpack.i.l.bf16 %v2546_v46 }
 0x7ff   :  { %v2463_v54 = vpack.c.bf16 %v2553_v47, %v2552_v48 }
 0x800   :  { %v2459_v53 = vpack.c.bf16 %v2548_v49, %v2547_v50  ;;  %v807_v57 = vpop.permute.xlu1 %806 }
 0x801   :  { %v809_v58 = vpop.permute.xlu0 %808 }
 0x802   :  { %2460 = vmatprep.subr.bf16.mxu1 %v2459_v53 }
 0x803   :  { %v2580_v12 = vpop.eup %2579  ;;  %2462 = vmatpush3.bf16.msra.mxu1 %v2459_v53 }
 0x804   :  { %v2582_v55 = vpop.eup %2581  ;;  %2465 = vmatprep.subr.msk.bf16.mxu1 %vm2950_vm2, %v2463_v54  ;;  %v718_v56 = vmul.f32 %v2580_v12, %v2576_v39  ;;  %v106_v39 = vld [vmem:[#allocation5] sm:$0xff] }
 0x805   :  { %v717_v10 = vmul.f32 %v2582_v55, %v2578_v40 }
 0x807   :  { %2335 = vmatprep.mubr.msk.f32.mxu1 %vm292_vm3, %v717_v10 }
 0x808   :  { %2336 = vmatmul.mubr.msk.f32.vlgmr.msra.gmra.mrb[6].mxu1 %vm292_vm3, %v718_v56 }
 0x809   :  { %2342 = vmatprep.mubr.msk.f32.mxu1 %vm206_vm1, %v807_v57 }
 0x80c   :  { %2468 = vmatpush3.bf16.xpose.msk.msra.mxu1 %vm2950_vm2, %v2463_v54 }
 0x80d   :  { %2481 = vmatprep.subr.bf16.mxu1 %v2782_v28 }
 0x813   :  { %2343 = vmatmul.mubr.msk.f32.vlgmr.msra.gmra.mrb[8].mxu1 %vm206_vm1, %v809_v58 }
 0x814   :  { %2371 = vmatprep.mubr.msk.f32.mxu1 %vm2783_vm4, %v2784_v33 }
 0x8db   :  { %v2337_v59 = vpop.f32.mrb[6].mxu1 }
 0x8dc   :  { %v797_v60 = vpop.f32.mrb[7].mxu1 }
 0x8e6   :  { %v2344_v61 = vpop.f32.mrb[8].mxu1 }
 0x8e7   :  { %v898_v62 = vmul.f32 0.35355338, %v2344_v61  ;;  %v888_v63 = vpop.f32.mrb[9].mxu1 }
 0x8e8   :  { %v897_v0 = vmul.f32 0.35355338, %v888_v63 }
 0x8e9   :  { %v902_v1 = vsel %vm292_vm3, %v898_v62, -inf }
 0x8ea   :  { %903 = vmax.xlane.f32.xlu0 %v902_v1  ;;  %v899_v2 = vsel %vm292_vm3, %v897_v0, -inf }
 0x8eb   :  { %900 = vmax.xlane.f32.xlu1 %v899_v2 }
 0x977   :  { %v904_v3 = vpop.xlane.xlu0 %903 }
 0x978   :  { %v906_v4 = vsub.f32 %v898_v62, %v904_v3  ;;  %v901_v5 = vpop.xlane.xlu1 %900 }
 0x979   :  { %v905_v17 = vsub.f32 %v897_v0, %v901_v5 }
 0x97a   :  { %v909_v6 = vmul.f32 1.442695, %v906_v4 }
 0x97b   :  { %v907_v7 = vmul.f32 1.442695, %v905_v17 }
 0x97c   :  { %2583 = vpow2.f32 %v909_v6 }
 0x97d   :  { %2585 = vpow2.f32 %v907_v7 }
 0x986   :  { %v2584_v8 = vpop.eup %2583 }
 0x987   :  { %v2586_v9 = vpop.eup %2585  ;;  %v914_v11 = vsel %vm292_vm3, %v2584_v8, 0.0 }
 0x988   :  { %915 = vadd.xlane.f32.xlu1 %v914_v11  ;;  %v911_v14 = vsel %vm292_vm3, %v2586_v9, 0.0 }
 0x989   :  { %912 = vadd.xlane.f32.xlu0 %v911_v14 }
 0x999   :  { %1010 = vrot.lane.b32.xlu1 %v3004_v26, %s2767_s22  ;;  %v1132_v26 = vld [vmem:[#allocation8 + $0x8] sm:$0xff] }
 0x99d   :  { %1012 = vrot.lane.b32.xlu1 %v3002_v25, %s2767_s22 }
 0x99f   :  { %2555 = vrot.lane.b32.xlu0 %v2944_v13, %s2780_s16  ;;  %v1131_v13 = vld [vmem:[#allocation8] sm:$0xff] }
 0x9a0   :  { %v2482_v29 = vpack.c.bf16 %v1132_v26, %v1131_v13 }
 0x9a1   :  { %1020 = vrot.lane.b32.xlu1 %v2337_v59, %s2781_s19 }
 0x9a2   :  { %2483 = vmatpush3.bf16.msra.mxu1 %v2482_v29 }
 0x9a3   :  { %1018 = vrot.lane.b32.xlu0 %v797_v60, %s2781_s19  ;;  %2484 = vmatprep.subr.bf16.mxu1 %v2782_v28 }
 0x9a6   :  { %2486 = vmatpush3.bf16.msra.mxu1 %v2485_v37 }
 0x9a9   :  { %2372 = vmatmul.mubr.msk.f32.vlgmr.msra.gmra.mrb[10].mxu1 %vm118_vm0, %v106_v39 }
 0xa15   :  { %v916_v15 = vpop.xlane.xlu1 %915 }
 0xa16   :  { %2587 = vrcp.f32 %v916_v15  ;;  %v913_v16 = vpop.xlane.xlu0 %912 }
 0xa17   :  { %2589 = vrcp.f32 %v913_v16 }
 0xa19   :  { %v1011_v46 = vpop.permute.xlu1 %1010 }
 0xa1a   :  { %v2556_v18 = vpop.permute.xlu0 %2555  ;;  %v1032_v50 = vsel %vm206_vm1, %v2981_v52, %v1011_v46 }
 0xa1b   :  { %v2558_v19 = vunpack.i.h.bf16 %v2556_v18  ;;  %v2557_v20 = vunpack.i.l.bf16 %v2556_v18 }
 0xa1d   :  { %v2469_v21 = vpack.c.bf16 %v2558_v19, %v2557_v20  ;;  %v1013_v47 = vpop.permute.xlu1 %1012 }
 0xa1e   :  { %v1019_v49 = vpop.permute.xlu0 %1018  ;;  %v1033_v54 = vsel %vm206_vm1, %v2979_v51, %v1013_v47  ;;  %v2178_v51 = vld [vmem:[%s3168_s5] ss:$0 sm:$0xff] }
 0xa1f   :  { %2470 = vmatprep.subr.bf16.mxu0 %v2469_v21  ;;  %v1034_v12 = vsel %vm292_vm3, %v1032_v50, %v1019_v49 }
 0xa20   :  { %v2588_v22 = vpop.eup %2587  ;;  %2472 = vmatpush3.bf16.msra.mxu0 %v2469_v21 }
 0xa21   :  { %v2590_v23 = vpop.eup %2589  ;;  %v920_v25 = vmul.f32 %v2588_v22, %v2584_v8  ;;  %2474 = vmatprep.subr.bf16.mxu0 %v2473_v34  ;;  %v1021_v48 = vpop.permute.xlu1 %1020 }
 0xa22   :  { %v919_v24 = vmul.f32 %v2590_v23, %v2586_v9  ;;  %v1035_v10 = vsel %vm292_vm3, %v1033_v54, %v1021_v48 }
 0xa24   :  { %2349 = vmatprep.mubr.msk.f32.mxu0 %vm292_vm3, %v919_v24 }
 0xa25   :  { %2350 = vmatmul.mubr.msk.f32.vlgmr.msra.gmra.mrb[6].mxu0 %vm292_vm3, %v920_v25 }
 0xa26   :  { %2476 = vmatpush3.bf16.msra.mxu0 %v2473_v34 }
 0xa27   :  { %2478 = vmatprep.subr.bf16.mxu0 %v2477_v38 }
 0xa2a   :  { %2480 = vmatpush3.bf16.msra.mxu0 %v2477_v38 }
 0xa7c   :  { %v1211_v43 = vpop.f32.mrb[10].mxu1 }
 0xa7d   :  { %v3044_v44 = vadd.f32 %v2181_v42, %v1211_v43  ;;  %v2373_v45 = vpop.f32.mrb[11].mxu1 }
 0xa7f   :  { %2374 = vmatprep.subr.msk.mxu0 %vm206_vm1, %v3044_v44 }
 0xaf8   :  { %v2351_v40 = vpop.f32.mrb[6].mxu0 }
 0xaf9   :  { %1028 = vrot.lane.b32.xlu1 %v2351_v40, %s2785_s4  ;;  %v999_v41 = vpop.f32.mrb[7].mxu0 }
 0xafa   :  { %1026 = vrot.lane.b32.xlu0 %v999_v41, %s2785_s4 }
 0xafd   :  { %1610 = vrot.lane.b32.xlu1 %v3044_v44, %s2776_s14 }
 0xafe   :  { %1413 = vrot.lane.b32.xlu0 %v3044_v44, %s2773_s28 }
 0xb6b   :  { %v1029_v53 = vpop.permute.xlu1 %1028 }
 0xb6c   :  { %v1027_v55 = vpop.permute.xlu0 %1026  ;;  %v1038_v57 = vsel %vm1036_vm5, %v1035_v10, %v1029_v53 }
 0xb6d   :  { %v1037_v56 = vsel %vm1036_vm5, %v1034_v12, %v1027_v55 }
 0xb6e   :  { %2360 = vmatprep.mubr.msk.f32.mxu0 %vm118_vm0, %v1037_v56 }
 0xb6f   :  { %2361 = vmatmul.mubr.msk.f32.vlgmr.msra.gmra.mrb[8].mxu0 %vm118_vm0, %v1038_v57  ;;  %v1611_v62 = vpop.permute.xlu1 %1610 }
 0xb70   :  { %2375 = vmatpush3.xpose.msk.msra.mxu0 %vm206_vm1, %v3044_v44  ;;  %v1414_v52 = vpop.permute.xlu0 %1413 }
 0xb71   :  { %2384 = vmatprep.subr.msk.mxu0 %vm206_vm1, %v1414_v52 }
 0xc42   :  { %v2362_v58 = vpop.f32.mrb[8].mxu0 }
 0xc43   :  { %v1128_v59 = vadd.f32 %v2362_v58, %v2178_v51  ;;  %v1122_v60 = vpop.f32.mrb[9].mxu0 }
 0xc44   :  { %v1123_v61 = vadd.f32 %v2178_v51, %v1122_v60 }
 0xc45   :  { %1411 = vrot.lane.b32.xlu0 %v1128_v59, %s2773_s28 }
 0xc46   :  { %1409 = vrot.lane.b32.xlu1 %v1123_v61, %s2773_s28  ;;  %2376 = vmatprep.mubr.msk.f32.mxu0 %vm206_vm1, %v1123_v61 }
 0xc47   :  { %2377 = vmatmul.mubr.msk.f32.vlgmr.msra.gmra.mrb[10].mxu0 %vm206_vm1, %v1128_v59 }
 0xc48   :  { %2385 = vmatpush3.xpose.msk.msra.mxu0 %vm206_vm1, %v1414_v52 }
 0xc49   :  { %1606 = vrot.lane.b32.xlu0 %v1123_v61, %s2776_s14  ;;  %2394 = vmatprep.subr.msk.mxu0 %vm206_vm1, %v1611_v62 }
 0xc4a   :  { %1608 = vrot.lane.b32.xlu1 %v1128_v59, %s2776_s14 }
 0xc4d   :  { %1807 = vrot.lane.b32.xlu0 %v3044_v44, %s2778_s6 }
 0xc4e   :  { %1803 = vrot.lane.b32.xlu1 %v1123_v61, %s2778_s6 }
 0xc51   :  { %1805 = vrot.lane.b32.xlu0 %v1128_v59, %s2778_s6 }
 0xcb7   :  { %v1412_v63 = vpop.permute.xlu0 %1411 }
 0xcb8   :  { %v1410_v0 = vpop.permute.xlu1 %1409 }
 0xcb9   :  { %2386 = vmatprep.mubr.msk.f32.mxu0 %vm206_vm1, %v1410_v0 }
 0xcba   :  { %2387 = vmatmul.mubr.msk.f32.vlgmr.msra.gmra.mrb[12].mxu0 %vm206_vm1, %v1412_v63 }
 0xcbb   :  { %2395 = vmatpush3.xpose.msk.msra.mxu0 %vm206_vm1, %v1611_v62  ;;  %v1607_v1 = vpop.permute.xlu0 %1606 }
 0xcbc   :  { %2396 = vmatprep.mubr.msk.f32.mxu0 %vm206_vm1, %v1607_v1  ;;  %v1609_v2 = vpop.permute.xlu1 %1608 }
 0xcbe   :  { %2397 = vmatmul.mubr.msk.f32.vlgmr.msra.gmra.mrb[14].mxu0 %vm206_vm1, %v1609_v2 }
 0xcbf   :  { %v1808_v3 = vpop.permute.xlu0 %1807 }
 0xcc0   :  { %2404 = vmatprep.subr.msk.mxu0 %vm206_vm1, %v1808_v3  ;;  %v1804_v4 = vpop.permute.xlu1 %1803 }
 0xcc1   :  { %2405 = vmatpush3.xpose.msk.msra.mxu0 %vm206_vm1, %v1808_v3  ;;  %2406 = vmatprep.mubr.msk.f32.mxu0 %vm206_vm1, %v1804_v4 }
 0xcc3   :  { %v1806_v5 = vpop.permute.xlu0 %1805 }
 0xcc4   :  { %2407 = vmatmul.mubr.msk.f32.vlgmr.msra.gmra.mrb[16].mxu0 %vm206_vm1, %v1806_v5 }
 0xd1a   :  { %v2378_v17 = vpop.f32.mrb[10].mxu0 }
 0xd1b   :  { %v1300_v6 = vmul.f32 0.35355338, %v2378_v17  ;;  %v1290_v7 = vpop.f32.mrb[11].mxu0 }
 0xd1c   :  { %v1299_v8 = vmul.f32 0.35355338, %v1290_v7 }
 0xd1d   :  { %v1304_v9 = vsel %vm206_vm1, %v1300_v6, -inf }
 0xd1e   :  { %1305 = vmax.xlane.f32.xlu0 %v1304_v9  ;;  %v1301_v11 = vsel %vm206_vm1, %v1299_v8, -inf }
 0xd1f   :  { %1302 = vmax.xlane.f32.xlu1 %v1301_v11 }
 0xd8d   :  { %v2388_v14 = vpop.f32.mrb[12].mxu0 }
 0xd8e   :  { %v1497_v15 = vmul.f32 0.35355338, %v2388_v14  ;;  %v1487_v16 = vpop.f32.mrb[13].mxu0 }
 0xd8f   :  { %v1496_v18 = vmul.f32 0.35355338, %v1487_v16 }
 0xd90   :  { %v1501_v19 = vsel %vm206_vm1, %v1497_v15, -inf }
 0xd91   :  { %1502 = vmax.xlane.f32.xlu1 %v1501_v19  ;;  %v2398_v20 = vpop.f32.mrb[14].mxu0  ;;  %v1498_v21 = vsel %vm206_vm1, %v1496_v18, -inf }
 0xd92   :  { %v1694_v22 = vmul.f32 0.35355338, %v2398_v20  ;;  %1499 = vmax.xlane.f32.xlu0 %v1498_v21  ;;  %v1684_v23 = vpop.f32.mrb[15].mxu0 }
 0xd93   :  { %v1693_v24 = vmul.f32 0.35355338, %v1684_v23 }
 0xd94   :  { %v1698_v25 = vsel %vm206_vm1, %v1694_v22, -inf }
 0xd95   :  { %1699 = vmax.xlane.f32.xlu1 %v1698_v25  ;;  %v1695_v13 = vsel %vm206_vm1, %v1693_v24, -inf }
 0xd96   :  { %1696 = vmax.xlane.f32.xlu0 %v1695_v13 }
 0xd97   :  { %v2408_v26 = vpop.f32.mrb[16].mxu0 }
 0xd98   :  { %v1891_v27 = vmul.f32 0.35355338, %v2408_v26  ;;  %v1881_v28 = vpop.f32.mrb[17].mxu0 }
 0xd99   :  { %v1890_v29 = vmul.f32 0.35355338, %v1881_v28 }
 0xd9a   :  { %v1895_v30 = vsel %vm206_vm1, %v1891_v27, -inf }
 0xd9b   :  { %1896 = vmax.xlane.f32.xlu1 %v1895_v30  ;;  %v1892_v31 = vsel %vm206_vm1, %v1890_v29, -inf }
 0xd9c   :  { %1893 = vmax.xlane.f32.xlu0 %v1892_v31 }
 0xdab   :  { %v1306_v32 = vpop.xlane.xlu0 %1305 }
 0xdac   :  { %1522 = vrot.lane.b32.xlu1 %v3044_v44, %s2772_s13  ;;  %v1303_v33 = vpop.xlane.xlu1 %1302  ;;  %v1308_v34 = vsub.f32 %v1300_v6, %v1306_v32 }
 0xdad   :  { %v1307_v35 = vsub.f32 %v1299_v8, %v1303_v33 }
 0xdae   :  { %v1311_v36 = vmul.f32 1.442695, %v1308_v34 }
 0xdaf   :  { %v1309_v37 = vmul.f32 1.442695, %v1307_v35 }
 0xdb0   :  { %2591 = vpow2.f32 %v1311_v36 }
 0xdb1   :  { %2593 = vpow2.f32 %v1309_v37 }
 0xdb2   :  { %1325 = vrot.lane.b32.xlu0 %v3044_v44, %s2770_s2 }
 0xdba   :  { %v2592_v38 = vpop.eup %2591 }
 0xdbb   :  { %v2594_v39 = vpop.eup %2593  ;;  %v1316_v40 = vsel %vm206_vm1, %v2592_v38, 0.0 }
 0xdbc   :  { %v1313_v41 = vsel %vm206_vm1, %v2594_v39, 0.0 }
 0xdd0   :  { %1317 = vadd.xlane.f32.xlu1 %v1316_v40 }
 0xdd1   :  { %1314 = vadd.xlane.f32.xlu0 %v1313_v41 }
 0xe1e   :  { %v1503_v42 = vpop.xlane.xlu1 %1502 }
 0xe1f   :  { %v1505_v43 = vsub.f32 %v1497_v15, %v1503_v42  ;;  %v1500_v45 = vpop.xlane.xlu0 %1499 }
 0xe20   :  { %v1504_v46 = vsub.f32 %v1496_v18, %v1500_v45 }
 0xe21   :  { %v1508_v47 = vmul.f32 1.442695, %v1505_v43 }
 0xe22   :  { %v1506_v48 = vmul.f32 1.442695, %v1504_v46  ;;  %v1700_v49 = vpop.xlane.xlu1 %1699 }
 0xe23   :  { %2595 = vpow2.f32 %v1508_v47  ;;  %v1702_v50 = vsub.f32 %v1694_v22, %v1700_v49  ;;  %v1697_v53 = vpop.xlane.xlu0 %1696  ;;  %v2030_v47 = vld [vmem:[#allocation10] sm:$0xff] }
 0xe24   :  { %2597 = vpow2.f32 %v1506_v48  ;;  %v1701_v54 = vsub.f32 %v1693_v24, %v1697_v53  ;;  %v2031_v48 = vld [vmem:[#allocation10 + $0x8] sm:$0xff]  ;;  %v2033_v53 = vld [vmem:[#allocation10 + $0x18] sm:$0xff] }
 0xe25   :  { %v1705_v12 = vmul.f32 1.442695, %v1702_v50  ;;  %v2487_v49 = vpack.c.bf16 %v2031_v48, %v2030_v47  ;;  %v2032_v50 = vld [vmem:[#allocation10 + $0x10] sm:$0xff] }
 0xe26   :  { %v1703_v55 = vmul.f32 1.442695, %v1701_v54  ;;  %v2491_v54 = vpack.c.bf16 %v2033_v53, %v2032_v50 }
 0xe27   :  { %2599 = vpow2.f32 %v1705_v12  ;;  %2488 = vmatprep.subr.bf16.mxu0 %v2487_v49 }
 0xe28   :  { %2601 = vpow2.f32 %v1703_v55  ;;  %v1897_v10 = vpop.xlane.xlu1 %1896  ;;  %2490 = vmatpush3.bf16.msra.mxu0 %v2487_v49 }
 0xe29   :  { %v1899_v56 = vsub.f32 %v1891_v27, %v1897_v10  ;;  %v1894_v57 = vpop.xlane.xlu0 %1893  ;;  %2492 = vmatprep.subr.bf16.mxu0 %v2491_v54 }
 0xe2a   :  { %v1898_v52 = vsub.f32 %v1890_v29, %v1894_v57 }
 0xe2b   :  { %v1902_v51 = vmul.f32 1.442695, %v1899_v56 }
 0xe2c   :  { %v1900_v58 = vmul.f32 1.442695, %v1898_v52  ;;  %v1523_v63 = vpop.permute.xlu1 %1522  ;;  %2494 = vmatpush3.bf16.msra.mxu0 %v2491_v54 }
 0xe2d   :  { %v2596_v59 = vpop.eup %2595  ;;  %2603 = vpow2.f32 %v1902_v51  ;;  %v1326_v60 = vpop.permute.xlu0 %1325 }
 0xe2e   :  { %v2598_v61 = vpop.eup %2597  ;;  %2605 = vpow2.f32 %v1900_v58  ;;  %2379 = vmatprep.subr.mxu1 %v1326_v60  ;;  %v1513_v62 = vsel %vm206_vm1, %v2596_v59, 0.0 }
 0xe2f   :  { %2380 = vmatpush3.msra.mxu1 %v1326_v60  ;;  %1514 = vadd.xlane.f32.xlu1 %v1513_v62  ;;  %v1510_v0 = vsel %vm206_vm1, %v2598_v61, 0.0 }
 0xe30   :  { %1511 = vadd.xlane.f32.xlu0 %v1510_v0  ;;  %2389 = vmatprep.subr.mxu1 %v1523_v63 }
 0xe31   :  { %v2600_v1 = vpop.eup %2599 }
 0xe32   :  { %v2602_v2 = vpop.eup %2601  ;;  %v1710_v3 = vsel %vm206_vm1, %v2600_v1, 0.0 }
 0xe33   :  { %1711 = vadd.xlane.f32.xlu1 %v1710_v3  ;;  %v1707_v4 = vsel %vm206_vm1, %v2602_v2, 0.0 }
 0xe34   :  { %1708 = vadd.xlane.f32.xlu0 %v1707_v4 }
 0xe37   :  { %v2604_v5 = vpop.eup %2603 }
 0xe38   :  { %v2606_v17 = vpop.eup %2605  ;;  %v1907_v6 = vsel %vm206_vm1, %v2604_v5, 0.0 }
 0xe39   :  { %1908 = vadd.xlane.f32.xlu1 %v1907_v6  ;;  %v1904_v7 = vsel %vm206_vm1, %v2606_v17, 0.0 }
 0xe3a   :  { %1905 = vadd.xlane.f32.xlu0 %v1904_v7 }
 0xe4a   :  { %1719 = vrot.lane.b32.xlu1 %v3044_v44, %s2775_s12 }
 0xe50   :  { %1916 = vrot.lane.b32.xlu0 %v3044_v44, %s2777_s15 }
 0xe5d   :  { %v1318_v8 = vpop.xlane.xlu1 %1317 }
 0xe5e   :  { %2607 = vrcp.f32 %v1318_v8  ;;  %v1315_v9 = vpop.xlane.xlu0 %1314 }
 0xe5f   :  { %2609 = vrcp.f32 %v1315_v9 }
 0xe68   :  { %v2608_v11 = vpop.eup %2607 }
 0xe69   :  { %v2610_v14 = vpop.eup %2609  ;;  %v1322_v16 = vmul.f32 %v2608_v11, %v2592_v38 }
 0xe6a   :  { %v1320_v15 = vmul.f32 %v2610_v14, %v2594_v39 }
 0xe6c   :  { %2381 = vmatprep.mubr.msk.f32.mxu1 %vm206_vm1, %v1320_v15 }
 0xe6d   :  { %2382 = vmatmul.mubr.msk.f32.vlgmr.msra.gmra.mrb[12].mxu1 %vm206_vm1, %v1322_v16 }
 0xe6e   :  { %2390 = vmatpush3.msra.mxu1 %v1523_v63 }
 0xebc   :  { %v1515_v18 = vpop.xlane.xlu1 %1514 }
 0xebd   :  { %2611 = vrcp.f32 %v1515_v18  ;;  %v1512_v19 = vpop.xlane.xlu0 %1511 }
 0xebe   :  { %2613 = vrcp.f32 %v1512_v19 }
 0xec0   :  { %v1712_v20 = vpop.xlane.xlu1 %1711 }
 0xec1   :  { %2615 = vrcp.f32 %v1712_v20  ;;  %v1709_v44 = vpop.xlane.xlu0 %1708 }
 0xec2   :  { %2617 = vrcp.f32 %v1709_v44 }
 0xec6   :  { %v1909_v21 = vpop.xlane.xlu1 %1908 }
 0xec7   :  { %v2612_v22 = vpop.eup %2611  ;;  %2619 = vrcp.f32 %v1909_v21  ;;  %v1906_v23 = vpop.xlane.xlu0 %1905 }
 0xec8   :  { %v2614_v24 = vpop.eup %2613  ;;  %2621 = vrcp.f32 %v1906_v23  ;;  %v1519_v13 = vmul.f32 %v2612_v22, %v2596_v59 }
 0xec9   :  { %v1517_v25 = vmul.f32 %v2614_v24, %v2598_v61 }
 0xeca   :  { %v1720_v26 = vpop.permute.xlu1 %1719  ;;  %v1521_v32 = vadd.f32 %v1519_v13, %v1322_v16 }
 0xecb   :  { %v2616_v27 = vpop.eup %2615  ;;  %v1917_v28 = vpop.permute.xlu0 %1916  ;;  %2391 = vmatprep.mubr.msk.f32.mxu1 %vm206_vm1, %v1517_v25  ;;  %2399 = vmatprep.subr.mxu1 %v1720_v26  ;;  %v1520_v34 = vadd.f32 %v1517_v25, %v1320_v15 }
 0xecc   :  { %v2618_v29 = vpop.eup %2617  ;;  %2392 = vmatmul.mubr.msk.f32.vlgmr.msra.gmra.mrb[14].mxu1 %vm206_vm1, %v1519_v13  ;;  %v1716_v31 = vmul.f32 %v2616_v27, %v2600_v1 }
 0xecd   :  { %2400 = vmatpush3.msra.mxu1 %v1720_v26  ;;  %v1714_v30 = vmul.f32 %v2618_v29, %v2602_v2 }
 0xece   :  { %2409 = vmatprep.subr.mxu1 %v1917_v28  ;;  %v1718_v36 = vadd.f32 %v1716_v31, %v1521_v32 }
 0xecf   :  { %2401 = vmatprep.mubr.msk.f32.mxu1 %vm206_vm1, %v1714_v30  ;;  %v1717_v38 = vadd.f32 %v1714_v30, %v1520_v34 }
 0xed0   :  { %2402 = vmatmul.mubr.msk.f32.vlgmr.msra.gmra.mrb[16].mxu1 %vm206_vm1, %v1716_v31 }
 0xed1   :  { %v2620_v33 = vpop.eup %2619  ;;  %2410 = vmatpush3.msra.mxu1 %v1917_v28 }
 0xed2   :  { %v2622_v35 = vpop.eup %2621  ;;  %v1913_v37 = vmul.f32 %v2620_v33, %v2604_v5  ;;  %v2203_v5 = vld [vmem:[%s3172_s9] ss:$0 sm:$0xff] }
 0xed3   :  { %v1911_v39 = vmul.f32 %v2622_v35, %v2606_v17 }
 0xed4   :  { %v1915_v40 = vadd.f32 %v1913_v37, %v1718_v36 }
 0xed5   :  { %v1914_v41 = vadd.f32 %v1911_v39, %v1717_v38  ;;  %2411 = vmatprep.mubr.msk.f32.mxu1 %vm206_vm1, %v1911_v39 }
 0xed6   :  { %v2125_v42 = vmul.f32 0.25, %v1915_v40  ;;  %2412 = vmatmul.mubr.msk.f32.vlgmr.msra.gmra.mrb[18].mxu1 %vm206_vm1, %v1913_v37 }
 0xed7   :  { %v2124_v43 = vmul.f32 0.25, %v1914_v41 }
 0xed8   :  { %2127 = vst.msk [vmem:[%s3174_s11 + $0x8] sm:$0xff] %vm206_vm1, %v2125_v42 }
 0xed9   :  { %2126 = vst.msk [vmem:[%s3174_s11] sm:$0xff] %vm206_vm1, %v2124_v43 }
 0xf40   :  { %v2383_v45 = vpop.f32.mrb[12].mxu1 }
 0xf41   :  { %v1400_v46 = vpop.f32.mrb[13].mxu1 }
 0xf9f   :  { %v2393_v12 = vpop.f32.mrb[14].mxu1 }
 0xfa0   :  { %2004 = vrot.lane.b32.xlu0 %v2393_v12, %s2767_s22  ;;  %v1597_v55 = vpop.f32.mrb[15].mxu1 }
 0xfa1   :  { %2002 = vrot.lane.b32.xlu1 %v1597_v55, %s2767_s22 }
 0xfa3   :  { %v2403_v10 = vpop.f32.mrb[16].mxu1 }
 0xfa4   :  { %2012 = vrot.lane.b32.xlu0 %v2403_v10, %s2781_s19  ;;  %v1794_v56 = vpop.f32.mrb[17].mxu1 }
 0xfa5   :  { %2010 = vrot.lane.b32.xlu1 %v1794_v56, %s2781_s19 }
 0xfa9   :  { %v2413_v57 = vpop.f32.mrb[18].mxu1 }
 0xfaa   :  { %2020 = vrot.lane.b32.xlu0 %v2413_v57, %s2785_s4  ;;  %v1991_v52 = vpop.f32.mrb[19].mxu1 }
 0xfab   :  { %2018 = vrot.lane.b32.xlu1 %v1991_v52, %s2785_s4 }
0x1012   :  { %v2005_v51 = vpop.permute.xlu0 %2004 }
0x1013   :  { %v2003_v58 = vpop.permute.xlu1 %2002  ;;  %v2025_v63 = vsel %vm206_vm1, %v2383_v45, %v2005_v51 }
0x1014   :  { %v2024_v61 = vsel %vm206_vm1, %v1400_v46, %v2003_v58 }
0x1016   :  { %v2013_v59 = vpop.permute.xlu0 %2012 }
0x1017   :  { %v2011_v60 = vpop.permute.xlu1 %2010  ;;  %v2027_v2 = vsel %vm292_vm3, %v2025_v63, %v2013_v59 }
0x1018   :  { %v2026_v0 = vsel %vm292_vm3, %v2024_v61, %v2011_v60 }
0x101c   :  { %v2021_v62 = vpop.permute.xlu0 %2020 }
0x101d   :  { %v2019_v1 = vpop.permute.xlu1 %2018  ;;  %v2029_v4 = vsel %vm1036_vm5, %v2027_v2, %v2021_v62 }
0x101e   :  { %v2028_v3 = vsel %vm1036_vm5, %v2026_v0, %v2019_v1 }
0x101f   :  { %2422 = vmatprep.mubr.msk.f32.mxu0 %vm118_vm0, %v2028_v3 }
0x1020   :  { %2423 = vmatmul.mubr.msk.f32.vlgmr.msra.gmra.mrb[18].mxu0 %vm118_vm0, %v2029_v4 }
0x10f3   :  { %v2424_v17 = vpop.f32.mrb[18].mxu0 }
0x10f4   :  { %v2119_v6 = vadd.f32 %v2424_v17, %v2203_v5  ;;  %v2113_v7 = vpop.f32.mrb[19].mxu0 }
0x10f5   :  { %v2114_v8 = vadd.f32 %v2203_v5, %v2113_v7 }
0x10f6   :  { %2123 = vst.msk [vmem:[#allocation11 + $0x8] sm:$0xff] %vm118_vm0, %v2119_v6 }
0x10f7   :  { %2122 = vst.msk [vmem:[#allocation11] sm:$0xff] %vm118_vm0, %v2114_v8 }
0x10f8   :  { %2744 = shalt.err (!%p2741_p2)
}
0x10f9   :  { %s2745_s2 = scalar_lea.hbm %s3173_s10, 256 }
0x10fa   :  { %p2746_p3 = scmp.ne.s32.totalorder %s3173_s10, %s2745_s2  ;;  %p2749_p4 = scmp.lt.u32.totalorder %s2745_s2, %s3173_s10 }
0x10fc   :  { %p2751_p5 = pnand %p2749_p4, %p2746_p3 }
0x10fe   :  { %2754 = shalt.err (!%p2751_p5)
}
0x10ff   :  { %2139 = dma.vmem_to_hbm [thread:$0]  %s2134_s20, 256, %s3173_s10, [#allocation4], %s2766_s18, %s2766_s18, %s2767_s22  }
0x1100   :  { %2761 = dma.done.wait [#allocation4], 256  }
0x1101   :  { %2762 = vsyncadd [#allocation4], 4294967040 }
0x1102   :  { %2147 = vsyncpa [#allocation3], 1 }
0x1103   :  { %2148 = vsyncpa [#allocation6], 1 }
0x1104   :  { %2149 = vsyncpa [#allocation9], 1 }
0x1105   :  { %2150 = vsyncpa [#allocation4], 1 }

</bundles_post_ra>
